<compile_context>
chip_gen: v5e
topology: v5e:2x2
jax: 0.10.0
libtpu: 0.0.40
codegen_flags: <defaults>
</compile_context>

<pallas_src>
import functools

import jax
import jax.numpy as jnp
from jax.experimental import pallas as pl
from jax.experimental.pallas import tpu as pltpu


_VMEM_LIMIT = 32 * 1024 * 1024     # explicit scoped-VMEM ceiling (v5e/v6e/v7x safe)
_TILE_BUDGET = 12 * 1024 * 1024    # budget for double-buffered a/out/weight tiles


def _round_up(x, m):
    return (x + m - 1) // m * m


def _pick_tile(M, K, ncols, cap=512, budget=_TILE_BUDGET):
    """Row tile (multiple of 16, bf16-friendly) whose double-buffered VMEM
    footprint fits the budget; keeps the grid >= 2 steps whenever M allows it
    (v7x dual-TensorCore sharding + 2-deep pipelining)."""
    fixed = 2 * K * ncols * 2                          # stationary bf16 weight, 2 bufs
    t = cap
    while t > 16 and fixed + 2 * t * (K + ncols) * 2 > budget:
        t //= 2
    mp = _round_up(M, 16)
    while t > 16 and mp <= t:                          # ensure >= 2 grid steps
        t //= 2
    return t


# ----------------------------- Pallas kernels ------------------------------ #

def matmul_stats_kernel(a_ref, b_ref, o_ref, sum_ref, sq_ref):
    """MXU matmul (bf16 in, f32 acc, bf16 out) + fused per-column partial
    sum / sum-of-squares in f32 (packed (1,1,ncols) per grid step)."""
    acc = jnp.dot(a_ref[...], b_ref[...], preferred_element_type=jnp.float32)
    o_ref[...] = acc.astype(o_ref.dtype)
    sum_ref[...] = jnp.sum(acc, axis=0, keepdims=True)[None]
    sq_ref[...] = jnp.sum(acc * acc, axis=0, keepdims=True)[None]


def pallas_matmul_stats(a, b):
    """(M,K)x(K,N) -> bf16 (M,N); also f32 per-column sums / sums of squares."""
    M, K = a.shape
    _, ncols = b.shape
    tm = _pick_tile(M, K, ncols)
    Mp = _round_up(M, tm)
    if Mp != M:
        a = jnp.pad(a, ((0, Mp - M), (0, 0)))          # zero rows: stats unaffected
    T = Mp // tm
    o, s, q = pl.pallas_call(
        matmul_stats_kernel,
        out_shape=(jax.ShapeDtypeStruct((Mp, ncols), jnp.bfloat16),
                   jax.ShapeDtypeStruct((T, 1, ncols), jnp.float32),
                   jax.ShapeDtypeStruct((T, 1, ncols), jnp.float32)),
        grid=(T,),
        in_specs=[pl.BlockSpec((tm, K), lambda i: (i, 0)),
                  pl.BlockSpec((K, ncols), lambda i: (0, 0))],
        out_specs=(pl.BlockSpec((tm, ncols), lambda i: (i, 0)),
                   pl.BlockSpec((1, 1, ncols), lambda i: (i, 0, 0)),
                   pl.BlockSpec((1, 1, ncols), lambda i: (i, 0, 0))),
        compiler_params=pltpu.CompilerParams(
            dimension_semantics=("parallel",),
            vmem_limit_bytes=_VMEM_LIMIT),
    )(a, b)
    return o[:M], s[:, 0, :].sum(axis=0), q[:, 0, :].sum(axis=0)


def matmul_affine_relu_kernel(a_ref, scale_ref, shift_ref, b_ref, o_ref):
    """BN affine + ReLU prologue (bf16 input upcast to f32) fused into an MXU
    matmul (bf16 operands, f32 accumulation, bf16 store)."""
    a = a_ref[...].astype(jnp.float32)
    a = jnp.maximum(a * scale_ref[...] + shift_ref[...], 0.0)
    o_ref[...] = jnp.dot(a.astype(jnp.bfloat16), b_ref[...],
                         preferred_element_type=jnp.float32).astype(o_ref.dtype)


def pallas_matmul_affine_relu(a, scale, shift, b):
    M, K = a.shape
    _, ncols = b.shape
    tm = _pick_tile(M, K, ncols)
    Mp = _round_up(M, tm)
    if Mp != M:
        a = jnp.pad(a, ((0, Mp - M), (0, 0)))          # padded rows sliced off below
    o = pl.pallas_call(
        matmul_affine_relu_kernel,
        out_shape=jax.ShapeDtypeStruct((Mp, ncols), jnp.bfloat16),
        grid=(Mp // tm,),
        in_specs=[pl.BlockSpec((tm, K), lambda i: (i, 0)),
                  pl.BlockSpec((1, K), lambda i: (0, 0)),
                  pl.BlockSpec((1, K), lambda i: (0, 0)),
                  pl.BlockSpec((K, ncols), lambda i: (0, 0))],
        out_specs=pl.BlockSpec((tm, ncols), lambda i: (i, 0)),
        compiler_params=pltpu.CompilerParams(
            dimension_semantics=("parallel",),
            vmem_limit_bytes=_VMEM_LIMIT),
    )(a, scale, shift, b)
    return o[:M]


# ------------------------------- glue (JAX) -------------------------------- #
# TODO(synk): the ConvTranspose col2im overlap-add (plus the fused channel
# stats and final tanh) runs as XLA glue between the Pallas matmuls; its
# overlap/scatter pattern has no clean BlockSpec expression.

def _shift2d(x, dh, dw, Hp, Wp):
    """y[:, m, q, :] = x[:, m-dh, q-dw, :] (0 when out of range); spatial (Hp, Wp)."""
    N, H, W, C = x.shape
    p_t, p_b = max(dh, 0), max(Hp - dh - H, 0)
    p_l, p_r = max(dw, 0), max(Wp - dw - W, 0)
    xp = jnp.pad(x, ((0, 0), (p_t, p_b), (p_l, p_r), (0, 0)))
    sh, sw = p_t - dh, p_l - dw
    return xp[:, sh:sh + Hp, sw:sw + Wp, :]


def _col2im_overlap_add(y6, k, s, p, Hout, Wout):
    """ConvTranspose2d overlap-add. y6: (N,H,W,k,k,C) f32 -> (N,Hout,Wout,C) f32.

    out[n, h*s-p+kh, w*s-p+kw, c] += y6[n, h, w, kh, kw, c]; dense (no scatter):
    decomposed by output phase (mod s) and interleaved back.
    """
    N, H, W, _, _, C = y6.shape
    assert Hout % s == 0 and Wout % s == 0
    Hp, Wp = Hout // s, Wout // s
    row_phases = []
    for rh in range(s):
        col_phases = []
        for rw in range(s):
            acc = jnp.zeros((N, Hp, Wp, C), y6.dtype)
            for kh in range(k):
                if (kh - p) % s != rh:
                    continue
                dh = (kh - p - rh) // s
                for kw in range(k):
                    if (kw - p) % s != rw:
                        continue
                    dw = (kw - p - rw) // s
                    acc = acc + _shift2d(y6[:, :, :, kh, kw, :], dh, dw, Hp, Wp)
            col_phases.append(acc)
        row_phases.append(jnp.stack(col_phases, axis=3))     # (N, Hp, Wp, s, C)
    out = jnp.stack(row_phases, axis=2)                      # (N, Hp, s, Wp, s, C)
    return out.reshape(N, Hout, Wout, C)


def _deconv_weight_cols(w):
    """torch ConvTranspose2d weight (C_in, C_out, kH, kW) -> (C_in, kH*kW*C_out) bf16."""
    cin, cout, k, _ = w.shape
    return jnp.transpose(w, (0, 2, 3, 1)).reshape(cin, k * k * cout).astype(jnp.bfloat16)


def _bn_scale_shift(sum_c, sq_c, count, gamma, beta, eps=1e-5):
    mean = sum_c / count
    var = jnp.maximum(sq_c / count - mean * mean, 0.0)   # clamp vs. cancellation
    inv = 1.0 / jnp.sqrt(var + eps)
    scale = gamma.reshape(-1) * inv
    shift = beta.reshape(-1) - mean * scale
    return scale.reshape(1, -1), shift.reshape(1, -1)


def init_params(key, ngf):
    ks = jax.random.split(key, 4)

    def w(k, shape):
        return 0.02 * jax.random.normal(k, shape, jnp.float32)

    return {
        "w1": w(ks[0], (100, ngf * 4, 4, 4)),
        "g1": jnp.ones((1, ngf * 4), jnp.float32), "b1": jnp.zeros((1, ngf * 4), jnp.float32),
        "w2": w(ks[1], (ngf * 4, ngf * 2, 4, 4)),
        "g2": jnp.ones((1, ngf * 2), jnp.float32), "b2": jnp.zeros((1, ngf * 2), jnp.float32),
        "w3": w(ks[2], (ngf * 2, ngf, 4, 4)),
        "g3": jnp.ones((1, ngf), jnp.float32), "b3": jnp.zeros((1, ngf), jnp.float32),
        "w4": w(ks[3], (ngf, 3, 4, 4)),
    }


def generator_forward(z, params, ngf):
    """z: (N, 100, 1, 1) NCHW. Returns (N, 3, 32, 32) NCHW (training-mode BN)."""
    N = z.shape[0]
    c1, c2, c3 = ngf * 4, ngf * 2, ngf

    # block 1: ConvTranspose2d(100, c1, 4, 1, 0) == pure matmul; K padded 100->128,
    # weight columns ordered (kh, kw, co) so the output is already NHWC-flat,
    # BN batch stats fused into the matmul epilogue (f32 partials).
    a1 = jnp.pad(z.reshape(N, 100).astype(jnp.float32), ((0, 0), (0, 28))).astype(jnp.bfloat16)
    w1m = jnp.transpose(params["w1"], (0, 2, 3, 1)).reshape(100, 16 * c1)
    w1m = jnp.pad(w1m, ((0, 28), (0, 0))).astype(jnp.bfloat16)
    y1, s1, q1 = pallas_matmul_stats(a1, w1m)                 # bf16 (N, 16*c1)
    sum_c = s1.reshape(16, c1).sum(axis=0)
    sq_c = q1.reshape(16, c1).sum(axis=0)
    scale, shift = _bn_scale_shift(sum_c, sq_c, N * 16, params["g1"], params["b1"])
    x = y1.reshape(N * 16, c1)                                # bf16 NHWC rows, H = W = 4
    H = W = 4
    cin = c1

    # blocks 2 & 3: ConvTranspose2d(k=4, s=2, p=1) + BN + ReLU.
    # Previous BN affine+ReLU is the matmul prologue; conv = col2im overlap-add
    # in f32 with the per-channel stats fused into the same XLA producer, then
    # downcast to bf16 for the next layer.
    for wk, gk, bk, cout in (("w2", "g2", "b2", c2), ("w3", "g3", "b3", c3)):
        wm = _deconv_weight_cols(params[wk])                  # (cin, 16*cout) bf16
        y = pallas_matmul_affine_relu(x, scale, shift, wm)    # bf16 (N*H*W, 16*cout)
        Hout, Wout = 2 * H, 2 * W
        y6 = y.reshape(N, H, W, 4, 4, cout).astype(jnp.float32)
        conv = _col2im_overlap_add(y6, 4, 2, 1, Hout, Wout)   # f32 (N,Hout,Wout,cout)
        sum_c = jnp.sum(conv, axis=(0, 1, 2))                 # fused with producer
        sq_c = jnp.sum(conv * conv, axis=(0, 1, 2))
        scale, shift = _bn_scale_shift(sum_c, sq_c, N * Hout * Wout,
                                       params[gk], params[bk])
        x = conv.astype(jnp.bfloat16).reshape(N * Hout * Wout, cout)
        H, W, cin = Hout, Wout, cout

    # block 4: ConvTranspose2d(ngf, 3, 4, 2, 1) + Tanh (block-3 BN+ReLU is prologue).
    # cout padded 3 -> 8 so the matmul output is a lane-dense 128-wide slab
    # (unmasked stores); dead channels (zero weights) sliced off before col2im,
    # tanh fuses with the overlap-add in XLA.
    w4p = jnp.pad(params["w4"], ((0, 0), (0, 5), (0, 0), (0, 0)))
    w4m = _deconv_weight_cols(w4p)                            # (cin, 128) bf16
    y4 = pallas_matmul_affine_relu(x, scale, shift, w4m)      # bf16 (N*H*W, 128)
    Hout, Wout = 2 * H, 2 * W
    y6 = y4.reshape(N, H, W, 4, 4, 8)[..., :3].astype(jnp.float32)
    conv = _col2im_overlap_add(y6, 4, 2, 1, Hout, Wout)       # (N, 32, 32, 3) f32
    out_nhwc = jnp.tanh(conv)                                 # fused elementwise epilogue
    return out_nhwc.transpose(0, 3, 1, 2)                     # back to NCHW


# --------------------- pure-JAX f32 reference (validation) ------------------ #

def _im2col_transposed(x_nhwc, k, stride, pad):
    N, H, W, C = x_nhwc.shape
    Hd = H + (H - 1) * (stride - 1)
    Wd = W + (W - 1) * (stride - 1)
    xd = jnp.zeros((N, Hd, Wd, C), x_nhwc.dtype)
    xd = xd.at[:, ::stride, ::stride, :].set(x_nhwc)
    pe = k - 1 - pad
    xp = jnp.pad(xd, ((0, 0), (pe, pe), (pe, pe), (0, 0)))
    Hout = (H - 1) * stride - 2 * pad + k
    Wout = (W - 1) * stride - 2 * pad + k
    cols = [xp[:, kh:kh + Hout, kw:kw + Wout, :] for kh in range(k) for kw in range(k)]
    patches = jnp.stack(cols, axis=3)
    return patches.reshape(N * Hout * Wout, k * k * C), Hout, Wout


def _deconv_weight_matrix(w):
    k = w.shape[2]
    w_flip = w[:, :, ::-1, ::-1]
    return jnp.transpose(w_flip, (2, 3, 0, 1)).reshape(k * k * w.shape[0], w.shape[1])


def reference_forward(z, params, ngf):
    N = z.shape[0]
    eps = 1e-5

    def bn_relu(y2, g, b):
        mean = y2.mean(axis=0, keepdims=True)
        var = ((y2 - mean) ** 2).mean(axis=0, keepdims=True)
        return jnp.maximum((y2 - mean) / jnp.sqrt(var + eps) * g + b, 0.0)

    y = z.reshape(N, 100) @ params["w1"].reshape(100, -1)
    y = y.reshape(N, ngf * 4, 4, 4).transpose(0, 2, 3, 1)
    x = bn_relu(y.reshape(N * 16, ngf * 4), params["g1"], params["b1"]).reshape(N, 4, 4, ngf * 4)
    for wk, gk, bk, cout in (("w2", "g2", "b2", ngf * 2), ("w3", "g3", "b3", ngf)):
        patches, Hout, Wout = _im2col_transposed(x, 4, 2, 1)
        y2 = patches @ _deconv_weight_matrix(params[wk])
        x = bn_relu(y2, params[gk], params[bk]).reshape(N, Hout, Wout, cout)
    patches, Hout, Wout = _im2col_transposed(x, 4, 2, 1)
    y2 = jnp.tanh(patches @ _deconv_weight_matrix(params["w4"]))
    return y2.reshape(N, Hout, Wout, 3).transpose(0, 3, 1, 2)


if __name__ == "__main__":
    ngf = 16          # small ngf for testing
    batch = 2

    key = jax.random.PRNGKey(0)
    kz, kp = jax.random.split(key)
    z = jax.random.normal(kz, (batch, 100, 1, 1), jnp.float32)
    params = init_params(kp, ngf)

    fwd = jax.jit(functools.partial(generator_forward, ngf=ngf))
    out = jax.block_until_ready(fwd(z, params))

    assert out.shape == (batch, 3, 32, 32), out.shape
    assert out.dtype == jnp.float32
    assert bool(jnp.all(jnp.isfinite(out)))
    assert bool(jnp.all(jnp.abs(out) <= 1.0))                 # tanh output range

    # numerical cross-check vs. pure-JAX f32 reference
    # (bf16 MXU operands + bf16 inter-layer activations -> small drift)
    ref = jax.block_until_ready(jax.jit(functools.partial(reference_forward, ngf=ngf))(z, params))
    max_err = float(jnp.max(jnp.abs(out - ref)))
    assert max_err < 0.12, max_err

    print("KERNEL_OK")
</pallas_src>

<mosaic_0001>
module attributes {stable_mosaic.version = 11 : i64} {
  func.func @matmul_stats_kernel(%arg0: i32, %arg1: memref<16x128xbf16, #tpu.memory_space<vmem>>, %arg2: memref<128x1024xbf16, #tpu.memory_space<vmem>>, %arg3: memref<16x1024xbf16, #tpu.memory_space<vmem>>, %arg4: memref<1x1x1024xf32, #tpu.memory_space<vmem>>, %arg5: memref<1x1x1024xf32, #tpu.memory_space<vmem>>) attributes {dimension_semantics = [#tpu.dimension_semantics<parallel>], iteration_bounds = array<i64: 1>, scalar_prefetch = 0 : i64, scratch_operands = 0 : i64, tpu.core_type = #tpu.core_type<tc>, window_params = [{transform_indices = @transform_0, window_bounds = array<i64: 16, 128>}, {pipeline_mode = #tpu.pipeline_mode<synchronous>, transform_indices = @transform_1, window_bounds = array<i64: 128, 1024>}, {transform_indices = @transform_2, window_bounds = array<i64: 16, 1024>}, {transform_indices = @transform_3, window_bounds = array<i64: 1, 1, 1024>}, {transform_indices = @transform_4, window_bounds = array<i64: 1, 1, 1024>}]} {
    %c0 = arith.constant 0 : index
    %c0_0 = arith.constant 0 : index
    %0 = vector.load %arg1[%c0, %c0_0] : memref<16x128xbf16, #tpu.memory_space<vmem>>, vector<16x128xbf16>
    %c0_1 = arith.constant 0 : index
    %c0_2 = arith.constant 0 : index
    %1 = vector.load %arg2[%c0_1, %c0_2] : memref<128x1024xbf16, #tpu.memory_space<vmem>>, vector<128x1024xbf16>
    %cst = arith.constant dense<0.000000e+00> : vector<16x1024xf32>
    %2 = tpu.matmul %0, %1, %cst {dimension_numbers = #tpu.dot_dimension_numbers<[1], [0], [0], [1], [0, 0, 1, 1], [], []>} : vector<16x128xbf16>, vector<128x1024xbf16>, vector<16x1024xf32> -> vector<16x1024xf32>
    %3 = arith.truncf %2 : vector<16x1024xf32> to vector<16x1024xbf16>
    %c0_3 = arith.constant 0 : index
    %c0_4 = arith.constant 0 : index
    %4 = vector.load %arg3[%c0_3, %c0_4] : memref<16x1024xbf16, #tpu.memory_space<vmem>>, vector<16x1024xbf16>
    tpu.vector_store %arg3[%c0_3, %c0_4], %3 {strides = array<i32>} : memref<16x1024xbf16, #tpu.memory_space<vmem>>, vector<16x1024xbf16>,
    %cst_5 = arith.constant dense<0.000000e+00> : vector<1024xf32>
    %5 = vector.multi_reduction <add>, %2, %cst_5 [0] : vector<16x1024xf32> to vector<1024xf32>
    %6 = vector.shape_cast %5 : vector<1024xf32> to vector<1x1024xf32>
    %7 = vector.shape_cast %6 : vector<1x1024xf32> to vector<1x1x1024xf32>
    %c0_6 = arith.constant 0 : index
    %c0_7 = arith.constant 0 : index
    %c0_8 = arith.constant 0 : index
    %8 = vector.load %arg4[%c0_6, %c0_7, %c0_8] : memref<1x1x1024xf32, #tpu.memory_space<vmem>>, vector<1x1x1024xf32>
    tpu.vector_store %arg4[%c0_6, %c0_7, %c0_8], %7 {strides = array<i32>} : memref<1x1x1024xf32, #tpu.memory_space<vmem>>, vector<1x1x1024xf32>,
    %9 = arith.mulf %2, %2 : vector<16x1024xf32>
    %cst_9 = arith.constant dense<0.000000e+00> : vector<1024xf32>
    %10 = vector.multi_reduction <add>, %9, %cst_9 [0] : vector<16x1024xf32> to vector<1024xf32>
    %11 = vector.shape_cast %10 : vector<1024xf32> to vector<1x1024xf32>
    %12 = vector.shape_cast %11 : vector<1x1024xf32> to vector<1x1x1024xf32>
    %c0_10 = arith.constant 0 : index
    %c0_11 = arith.constant 0 : index
    %c0_12 = arith.constant 0 : index
    %13 = vector.load %arg5[%c0_10, %c0_11, %c0_12] : memref<1x1x1024xf32, #tpu.memory_space<vmem>>, vector<1x1x1024xf32>
    tpu.vector_store %arg5[%c0_10, %c0_11, %c0_12], %12 {strides = array<i32>} : memref<1x1x1024xf32, #tpu.memory_space<vmem>>, vector<1x1x1024xf32>,
    return
  }
  func.func @transform_0(%arg0: i32) -> (i32, i32) {
    %c0_i32 = arith.constant 0 : i32
    %c0_i32_0 = arith.constant 0 : i32
    return %arg0, %c0_i32 : i32, i32
  }
  func.func @transform_1(%arg0: i32) -> (i32, i32) {
    %c0_i32 = arith.constant 0 : i32
    %c0_i32_0 = arith.constant 0 : i32
    %c0_i32_1 = arith.constant 0 : i32
    return %c0_i32, %c0_i32_0 : i32, i32
  }
  func.func @transform_2(%arg0: i32) -> (i32, i32) {
    %c0_i32 = arith.constant 0 : i32
    %c0_i32_0 = arith.constant 0 : i32
    return %arg0, %c0_i32 : i32, i32
  }
  func.func @transform_3(%arg0: i32) -> (i32, i32, i32) {
    %c0_i32 = arith.constant 0 : i32
    %c0_i32_0 = arith.constant 0 : i32
    %c0_i32_1 = arith.constant 0 : i32
    return %arg0, %c0_i32, %c0_i32_0 : i32, i32, i32
  }
  func.func @transform_4(%arg0: i32) -> (i32, i32, i32) {
    %c0_i32 = arith.constant 0 : i32
    %c0_i32_0 = arith.constant 0 : i32
    %c0_i32_1 = arith.constant 0 : i32
    return %arg0, %c0_i32, %c0_i32_0 : i32, i32, i32
  }
}

module attributes {stable_mosaic.version = 11 : i64} {
  func.func @matmul_affine_relu_kernel(%arg0: i32, %arg1: memref<16x64xbf16, #tpu.memory_space<vmem>>, %arg2: memref<1x64xf32, #tpu.memory_space<vmem>>, %arg3: memref<1x64xf32, #tpu.memory_space<vmem>>, %arg4: memref<64x512xbf16, #tpu.memory_space<vmem>>, %arg5: memref<16x512xbf16, #tpu.memory_space<vmem>>) attributes {dimension_semantics = [#tpu.dimension_semantics<parallel>], iteration_bounds = array<i64: 2>, scalar_prefetch = 0 : i64, scratch_operands = 0 : i64, tpu.core_type = #tpu.core_type<tc>, window_params = [{transform_indices = @transform_0, window_bounds = array<i64: 16, 64>}, {pipeline_mode = #tpu.pipeline_mode<synchronous>, transform_indices = @transform_1, window_bounds = array<i64: 1, 64>}, {pipeline_mode = #tpu.pipeline_mode<synchronous>, transform_indices = @transform_2, window_bounds = array<i64: 1, 64>}, {pipeline_mode = #tpu.pipeline_mode<synchronous>, transform_indices = @transform_3, window_bounds = array<i64: 64, 512>}, {transform_indices = @transform_4, window_bounds = array<i64: 16, 512>}]} {
    %c0 = arith.constant 0 : index
    %c0_0 = arith.constant 0 : index
    %0 = vector.load %arg1[%c0, %c0_0] : memref<16x64xbf16, #tpu.memory_space<vmem>>, vector<16x64xbf16>
    %1 = arith.extf %0 : vector<16x64xbf16> to vector<16x64xf32>
    %c0_1 = arith.constant 0 : index
    %c0_2 = arith.constant 0 : index
    %2 = vector.load %arg2[%c0_1, %c0_2] : memref<1x64xf32, #tpu.memory_space<vmem>>, vector<1x64xf32>
    %3 = vector.broadcast %2 : vector<1x64xf32> to vector<16x64xf32>
    %4 = arith.mulf %1, %3 : vector<16x64xf32>
    %c0_3 = arith.constant 0 : index
    %c0_4 = arith.constant 0 : index
    %5 = vector.load %arg3[%c0_3, %c0_4] : memref<1x64xf32, #tpu.memory_space<vmem>>, vector<1x64xf32>
    %6 = vector.broadcast %5 : vector<1x64xf32> to vector<16x64xf32>
    %7 = arith.addf %4, %6 : vector<16x64xf32>
    %cst = arith.constant 0.000000e+00 : f32
    %8 = vector.broadcast %cst : f32 to vector<16x64xf32>
    %9 = arith.maximumf %7, %8 : vector<16x64xf32>
    %10 = arith.truncf %9 : vector<16x64xf32> to vector<16x64xbf16>
    %c0_5 = arith.constant 0 : index
    %c0_6 = arith.constant 0 : index
    %11 = vector.load %arg4[%c0_5, %c0_6] : memref<64x512xbf16, #tpu.memory_space<vmem>>, vector<64x512xbf16>
    %cst_7 = arith.constant dense<0.000000e+00> : vector<16x512xf32>
    %12 = tpu.matmul %10, %11, %cst_7 {dimension_numbers = #tpu.dot_dimension_numbers<[1], [0], [0], [1], [0, 0, 1, 1], [], []>} : vector<16x64xbf16>, vector<64x512xbf16>, vector<16x512xf32> -> vector<16x512xf32>
    %13 = arith.truncf %12 : vector<16x512xf32> to vector<16x512xbf16>
    %c0_8 = arith.constant 0 : index
    %c0_9 = arith.constant 0 : index
    %14 = vector.load %arg5[%c0_8, %c0_9] : memref<16x512xbf16, #tpu.memory_space<vmem>>, vector<16x512xbf16>
    tpu.vector_store %arg5[%c0_8, %c0_9], %13 {strides = array<i32>} : memref<16x512xbf16, #tpu.memory_space<vmem>>, vector<16x512xbf16>,
    return
  }
  func.func @transform_0(%arg0: i32) -> (i32, i32) {
    %c0_i32 = arith.constant 0 : i32
    %c0_i32_0 = arith.constant 0 : i32
    return %arg0, %c0_i32 : i32, i32
  }
  func.func @transform_1(%arg0: i32) -> (i32, i32) {
    %c0_i32 = arith.constant 0 : i32
    %c0_i32_0 = arith.constant 0 : i32
    %c0_i32_1 = arith.constant 0 : i32
    return %c0_i32, %c0_i32_0 : i32, i32
  }
  func.func @transform_2(%arg0: i32) -> (i32, i32) {
    %c0_i32 = arith.constant 0 : i32
    %c0_i32_0 = arith.constant 0 : i32
    %c0_i32_1 = arith.constant 0 : i32
    return %c0_i32, %c0_i32_0 : i32, i32
  }
  func.func @transform_3(%arg0: i32) -> (i32, i32) {
    %c0_i32 = arith.constant 0 : i32
    %c0_i32_0 = arith.constant 0 : i32
    %c0_i32_1 = arith.constant 0 : i32
    return %c0_i32, %c0_i32_0 : i32, i32
  }
  func.func @transform_4(%arg0: i32) -> (i32, i32) {
    %c0_i32 = arith.constant 0 : i32
    %c0_i32_0 = arith.constant 0 : i32
    return %arg0, %c0_i32 : i32, i32
  }
}

module attributes {stable_mosaic.version = 11 : i64} {
  func.func @matmul_affine_relu_kernel(%arg0: i32, %arg1: memref<64x32xbf16, #tpu.memory_space<vmem>>, %arg2: memref<1x32xf32, #tpu.memory_space<vmem>>, %arg3: memref<1x32xf32, #tpu.memory_space<vmem>>, %arg4: memref<32x256xbf16, #tpu.memory_space<vmem>>, %arg5: memref<64x256xbf16, #tpu.memory_space<vmem>>) attributes {dimension_semantics = [#tpu.dimension_semantics<parallel>], iteration_bounds = array<i64: 2>, scalar_prefetch = 0 : i64, scratch_operands = 0 : i64, tpu.core_type = #tpu.core_type<tc>, window_params = [{transform_indices = @transform_0, window_bounds = array<i64: 64, 32>}, {pipeline_mode = #tpu.pipeline_mode<synchronous>, transform_indices = @transform_1, window_bounds = array<i64: 1, 32>}, {pipeline_mode = #tpu.pipeline_mode<synchronous>, transform_indices = @transform_2, window_bounds = array<i64: 1, 32>}, {pipeline_mode = #tpu.pipeline_mode<synchronous>, transform_indices = @transform_3, window_bounds = array<i64: 32, 256>}, {transform_indices = @transform_4, window_bounds = array<i64: 64, 256>}]} {
    %c0 = arith.constant 0 : index
    %c0_0 = arith.constant 0 : index
    %0 = vector.load %arg1[%c0, %c0_0] : memref<64x32xbf16, #tpu.memory_space<vmem>>, vector<64x32xbf16>
    %1 = arith.extf %0 : vector<64x32xbf16> to vector<64x32xf32>
    %c0_1 = arith.constant 0 : index
    %c0_2 = arith.constant 0 : index
    %2 = vector.load %arg2[%c0_1, %c0_2] : memref<1x32xf32, #tpu.memory_space<vmem>>, vector<1x32xf32>
    %3 = vector.broadcast %2 : vector<1x32xf32> to vector<64x32xf32>
    %4 = arith.mulf %1, %3 : vector<64x32xf32>
    %c0_3 = arith.constant 0 : index
    %c0_4 = arith.constant 0 : index
    %5 = vector.load %arg3[%c0_3, %c0_4] : memref<1x32xf32, #tpu.memory_space<vmem>>, vector<1x32xf32>
    %6 = vector.broadcast %5 : vector<1x32xf32> to vector<64x32xf32>
    %7 = arith.addf %4, %6 : vector<64x32xf32>
    %cst = arith.constant 0.000000e+00 : f32
    %8 = vector.broadcast %cst : f32 to vector<64x32xf32>
    %9 = arith.maximumf %7, %8 : vector<64x32xf32>
    %10 = arith.truncf %9 : vector<64x32xf32> to vector<64x32xbf16>
    %c0_5 = arith.constant 0 : index
    %c0_6 = arith.constant 0 : index
    %11 = vector.load %arg4[%c0_5, %c0_6] : memref<32x256xbf16, #tpu.memory_space<vmem>>, vector<32x256xbf16>
    %cst_7 = arith.constant dense<0.000000e+00> : vector<64x256xf32>
    %12 = tpu.matmul %10, %11, %cst_7 {dimension_numbers = #tpu.dot_dimension_numbers<[1], [0], [0], [1], [0, 0, 1, 1], [], []>} : vector<64x32xbf16>, vector<32x256xbf16>, vector<64x256xf32> -> vector<64x256xf32>
    %13 = arith.truncf %12 : vector<64x256xf32> to vector<64x256xbf16>
    %c0_8 = arith.constant 0 : index
    %c0_9 = arith.constant 0 : index
    %14 = vector.load %arg5[%c0_8, %c0_9] : memref<64x256xbf16, #tpu.memory_space<vmem>>, vector<64x256xbf16>
    tpu.vector_store %arg5[%c0_8, %c0_9], %13 {strides = array<i32>} : memref<64x256xbf16, #tpu.memory_space<vmem>>, vector<64x256xbf16>,
    return
  }
  func.func @transform_0(%arg0: i32) -> (i32, i32) {
    %c0_i32 = arith.constant 0 : i32
    %c0_i32_0 = arith.constant 0 : i32
    return %arg0, %c0_i32 : i32, i32
  }
  func.func @transform_1(%arg0: i32) -> (i32, i32) {
    %c0_i32 = arith.constant 0 : i32
    %c0_i32_0 = arith.constant 0 : i32
    %c0_i32_1 = arith.constant 0 : i32
    return %c0_i32, %c0_i32_0 : i32, i32
  }
  func.func @transform_2(%arg0: i32) -> (i32, i32) {
    %c0_i32 = arith.constant 0 : i32
    %c0_i32_0 = arith.constant 0 : i32
    %c0_i32_1 = arith.constant 0 : i32
    return %c0_i32, %c0_i32_0 : i32, i32
  }
  func.func @transform_3(%arg0: i32) -> (i32, i32) {
    %c0_i32 = arith.constant 0 : i32
    %c0_i32_0 = arith.constant 0 : i32
    %c0_i32_1 = arith.constant 0 : i32
    return %c0_i32, %c0_i32_0 : i32, i32
  }
  func.func @transform_4(%arg0: i32) -> (i32, i32) {
    %c0_i32 = arith.constant 0 : i32
    %c0_i32_0 = arith.constant 0 : i32
    return %arg0, %c0_i32 : i32, i32
  }
}

module attributes {stable_mosaic.version = 11 : i64} {
  func.func @matmul_affine_relu_kernel(%arg0: i32, %arg1: memref<256x16xbf16, #tpu.memory_space<vmem>>, %arg2: memref<1x16xf32, #tpu.memory_space<vmem>>, %arg3: memref<1x16xf32, #tpu.memory_space<vmem>>, %arg4: memref<16x128xbf16, #tpu.memory_space<vmem>>, %arg5: memref<256x128xbf16, #tpu.memory_space<vmem>>) attributes {dimension_semantics = [#tpu.dimension_semantics<parallel>], iteration_bounds = array<i64: 2>, scalar_prefetch = 0 : i64, scratch_operands = 0 : i64, tpu.core_type = #tpu.core_type<tc>, window_params = [{transform_indices = @transform_0, window_bounds = array<i64: 256, 16>}, {pipeline_mode = #tpu.pipeline_mode<synchronous>, transform_indices = @transform_1, window_bounds = array<i64: 1, 16>}, {pipeline_mode = #tpu.pipeline_mode<synchronous>, transform_indices = @transform_2, window_bounds = array<i64: 1, 16>}, {pipeline_mode = #tpu.pipeline_mode<synchronous>, transform_indices = @transform_3, window_bounds = array<i64: 16, 128>}, {transform_indices = @transform_4, window_bounds = array<i64: 256, 128>}]} {
    %c0 = arith.constant 0 : index
    %c0_0 = arith.constant 0 : index
    %0 = vector.load %arg1[%c0, %c0_0] : memref<256x16xbf16, #tpu.memory_space<vmem>>, vector<256x16xbf16>
    %1 = arith.extf %0 : vector<256x16xbf16> to vector<256x16xf32>
    %c0_1 = arith.constant 0 : index
    %c0_2 = arith.constant 0 : index
    %2 = vector.load %arg2[%c0_1, %c0_2] : memref<1x16xf32, #tpu.memory_space<vmem>>, vector<1x16xf32>
    %3 = vector.broadcast %2 : vector<1x16xf32> to vector<256x16xf32>
    %4 = arith.mulf %1, %3 : vector<256x16xf32>
    %c0_3 = arith.constant 0 : index
    %c0_4 = arith.constant 0 : index
    %5 = vector.load %arg3[%c0_3, %c0_4] : memref<1x16xf32, #tpu.memory_space<vmem>>, vector<1x16xf32>
    %6 = vector.broadcast %5 : vector<1x16xf32> to vector<256x16xf32>
    %7 = arith.addf %4, %6 : vector<256x16xf32>
    %cst = arith.constant 0.000000e+00 : f32
    %8 = vector.broadcast %cst : f32 to vector<256x16xf32>
    %9 = arith.maximumf %7, %8 : vector<256x16xf32>
    %10 = arith.truncf %9 : vector<256x16xf32> to vector<256x16xbf16>
    %c0_5 = arith.constant 0 : index
    %c0_6 = arith.constant 0 : index
    %11 = vector.load %arg4[%c0_5, %c0_6] : memref<16x128xbf16, #tpu.memory_space<vmem>>, vector<16x128xbf16>
    %cst_7 = arith.constant dense<0.000000e+00> : vector<256x128xf32>
    %12 = tpu.matmul %10, %11, %cst_7 {dimension_numbers = #tpu.dot_dimension_numbers<[1], [0], [0], [1], [0, 0, 1, 1], [], []>} : vector<256x16xbf16>, vector<16x128xbf16>, vector<256x128xf32> -> vector<256x128xf32>
    %13 = arith.truncf %12 : vector<256x128xf32> to vector<256x128xbf16>
    %c0_8 = arith.constant 0 : index
    %c0_9 = arith.constant 0 : index
    %14 = vector.load %arg5[%c0_8, %c0_9] : memref<256x128xbf16, #tpu.memory_space<vmem>>, vector<256x128xbf16>
    tpu.vector_store %arg5[%c0_8, %c0_9], %13 {strides = array<i32>} : memref<256x128xbf16, #tpu.memory_space<vmem>>, vector<256x128xbf16>,
    return
  }
  func.func @transform_0(%arg0: i32) -> (i32, i32) {
    %c0_i32 = arith.constant 0 : i32
    %c0_i32_0 = arith.constant 0 : i32
    return %arg0, %c0_i32 : i32, i32
  }
  func.func @transform_1(%arg0: i32) -> (i32, i32) {
    %c0_i32 = arith.constant 0 : i32
    %c0_i32_0 = arith.constant 0 : i32
    %c0_i32_1 = arith.constant 0 : i32
    return %c0_i32, %c0_i32_0 : i32, i32
  }
  func.func @transform_2(%arg0: i32) -> (i32, i32) {
    %c0_i32 = arith.constant 0 : i32
    %c0_i32_0 = arith.constant 0 : i32
    %c0_i32_1 = arith.constant 0 : i32
    return %c0_i32, %c0_i32_0 : i32, i32
  }
  func.func @transform_3(%arg0: i32) -> (i32, i32) {
    %c0_i32 = arith.constant 0 : i32
    %c0_i32_0 = arith.constant 0 : i32
    %c0_i32_1 = arith.constant 0 : i32
    return %c0_i32, %c0_i32_0 : i32, i32
  }
  func.func @transform_4(%arg0: i32) -> (i32, i32) {
    %c0_i32 = arith.constant 0 : i32
    %c0_i32_0 = arith.constant 0 : i32
    return %arg0, %c0_i32 : i32, i32
  }
}

</mosaic_0001>

<bundles_post_ra>
// kernel: generator_forward.5
= control target key start
LH: loop header
LB: loop body
LE: loop exit
PB: predicated region body
PF: predicated region fallthrough
CT: control target
= control target key end

     0   :  { %s589_s15 = smov 0   ;;  %s710_s0 = inlined_call_operand.vmem [shape: bf16[32,64], index: 0, kind: input, shape index: {}]   ;;  %s711_s1 = inlined_call_operand.vmem [shape: f32[1,64], index: 1, kind: input, shape index: {}]   ;;  %s712_s2 = inlined_call_operand.vmem [shape: f32[1,64], index: 2, kind: input, shape index: {}]   ;;  %s713_s3 = inlined_call_operand.vmem [shape: bf16[64,512], index: 3, kind: input, shape index: {}]   ;;  %s714_s4 = inlined_call_operand.vmem [shape: bf16[32,512], index: 4, kind: output, shape index: {}]  }
   0x1 LB: > { %s445_s16 = sadd.s32 4294967295, %s562_s15   ;;  %p449_p0 = scmp.ge.s32.totalorder %s562_s15, 1  ;;  %s562_s15 = sphi %s589_s15, %s14_s15  }
   0x2   : > { %p163_p1 = scmp.lt.s32.totalorder %s562_s15, 3 }
   0x4   : > { %p164_p2 = pnand %p449_p0, %p163_p1 }
   0x5   : > { %s450_s7 = sshll.u32 (!%p164_p2), %s445_s16, 1 }
   0x6   : > { %167 = sbr.rel (%p164_p2) target bundleno = 179 (0xb3), region = 36  ;;  %p191_p3 = scmp.lt.s32.totalorder (!%p164_p2), %s450_s7, 3 }
   0xb   : > { %v505_v0 = vld [vmem:[%s713_s3 + $0x60] sm:$0xf]  ;;  %v540_v1 = vld [vmem:[%s713_s3 + $0x6c] sm:$0xf0]  ;;  %v538_v2 = vld [vmem:[%s713_s3 + $0x64] sm:$0xf] }
   0xc   : > { %v506_v3 = vor.u32 %v540_v1, %v505_v0  ;;  %v507_v4 = vld [vmem:[%s713_s3 + $0x70] sm:$0xf0]  ;;  %v513_v5 = vld [vmem:[%s713_s3 + $0x68] sm:$0xf]  ;;  %v541_v6 = vld [vmem:[%s713_s3 + $0x74] sm:$0xf0] }
   0xd   : > { %v510_v7 = vor.u32 %v538_v2, %v507_v4  ;;  %v514_v8 = vor.u32 %v541_v6, %v513_v5  ;;  %v539_v9 = vld [vmem:[%s713_s3 + $0x6c] sm:$0xf]  ;;  %v515_v10 = vld [vmem:[%s713_s3 + $0x78] sm:$0xf0]  ;;  %v489_v11 = vld [vmem:[%s713_s3 + $0x40] sm:$0xf] }
   0xe   : > { %327 = vmatpush.bf16.msra.mxu0 %v506_v3  ;;  %v518_v12 = vor.u32 %v539_v9, %v515_v10  ;;  %v536_v13 = vld [vmem:[%s713_s3 + $0x4c] sm:$0xf0]  ;;  %v534_v14 = vld [vmem:[%s713_s3 + $0x44] sm:$0xf]  ;;  %v491_v15 = vld [vmem:[%s713_s3 + $0x50] sm:$0xf0] }
   0xf   : > { %341 = vmatpush.bf16.msra.mxu1 %v510_v7  ;;  %355 = vmatpush.bf16.msra.mxu2 %v514_v8  ;;  %v490_v16 = vor.u32 %v536_v13, %v489_v11  ;;  %v494_v17 = vor.u32 %v534_v14, %v491_v15  ;;  %v497_v18 = vld [vmem:[%s713_s3 + $0x48] sm:$0xf]  ;;  %v537_v19 = vld [vmem:[%s713_s3 + $0x54] sm:$0xf0]  ;;  %v535_v20 = vld [vmem:[%s713_s3 + $0x4c] sm:$0xf] }
  0x10   : > { %369 = vmatpush.bf16.msra.mxu3 %v518_v12  ;;  %v498_v21 = vor.u32 %v537_v19, %v497_v18  ;;  %v499_v22 = vld [vmem:[%s713_s3 + $0x58] sm:$0xf0]  ;;  %v473_v23 = vld [vmem:[%s713_s3 + $0x20] sm:$0xf]  ;;  %v532_v24 = vld [vmem:[%s713_s3 + $0x2c] sm:$0xf0] }
  0x11   : > { %v502_v25 = vor.u32 %v535_v20, %v499_v22  ;;  %v530_v26 = vld [vmem:[%s713_s3 + $0x24] sm:$0xf]  ;;  %v475_v27 = vld [vmem:[%s713_s3 + $0x30] sm:$0xf0]  ;;  %v481_v28 = vld [vmem:[%s713_s3 + $0x28] sm:$0xf]  ;;  %v474_v29 = vor.u32 %v532_v24, %v473_v23 }
  0x12   : > { %328 = vmatpush.bf16.msra.mxu0 %v490_v16  ;;  %v533_v30 = vld [vmem:[%s713_s3 + $0x34] sm:$0xf0]  ;;  %v531_v31 = vld [vmem:[%s713_s3 + $0x2c] sm:$0xf]  ;;  %v483_v32 = vld [vmem:[%s713_s3 + $0x38] sm:$0xf0]  ;;  %v478_v33 = vor.u32 %v530_v26, %v475_v27 }
  0x13   : > { %342 = vmatpush.bf16.msra.mxu1 %v494_v17  ;;  %356 = vmatpush.bf16.msra.mxu2 %v498_v21  ;;  %v482_v34 = vor.u32 %v533_v30, %v481_v28  ;;  %v457_v35 = vld [vmem:[%s713_s3] sm:$0xf]  ;;  %v528_v36 = vld [vmem:[%s713_s3 + $0xc] sm:$0xf0]  ;;  %v526_v37 = vld [vmem:[%s713_s3 + $0x4] sm:$0xf]  ;;  %v486_v38 = vor.u32 %v531_v31, %v483_v32 }
  0x14   : > { %370 = vmatpush.bf16.msra.mxu3 %v502_v25  ;;  %v459_v39 = vld [vmem:[%s713_s3 + $0x10] sm:$0xf0]  ;;  %v465_v40 = vld [vmem:[%s713_s3 + $0x8] sm:$0xf]  ;;  %v529_v41 = vld [vmem:[%s713_s3 + $0x14] sm:$0xf0]  ;;  %v458_v44 = vor.u32 %v528_v36, %v457_v35 }
  0x15   : > { %v527_v42 = vld [vmem:[%s713_s3 + $0xc] sm:$0xf]  ;;  %v467_v43 = vld [vmem:[%s713_s3 + $0x18] sm:$0xf0]  ;;  %v462_v45 = vor.u32 %v526_v37, %v459_v39  ;;  %v466_v46 = vor.u32 %v529_v41, %v465_v40  ;;  %s716_s7 = smov (!%p191_p3, %s450_s7), 3  ;;  %vm319_vm0 = vcmask 523264  }
  0x16   : > { %329 = vmatpush.bf16.msra.mxu0 %v474_v29  ;;  %v470_v47 = vor.u32 %v527_v42, %v467_v43  ;;  %s451_s8 = sshll.u32 %s716_s7, 2  ;;  %v554_v48 = vld [vmem:[%s711_s1] ss:$0 sm:$0xff]  ;;  %s525_s17 = sshll.u32 %s716_s7, 4 }
  0x17   : > { %343 = vmatpush.bf16.msra.mxu1 %v478_v33  ;;  %357 = vmatpush.bf16.msra.mxu2 %v482_v34  ;;  %s194_s11 = scalar_lea.vmem %s710_s0, %s451_s8  ;;  %v555_v52 = vld [vmem:[%s712_s2] ss:$0 sm:$0xff]  ;;  %s201_s20 = scalar_lea.vmem %s714_s4, %s525_s17 }
  0x18   : > { %371 = vmatpush.bf16.msra.mxu3 %v486_v38  ;;  %v543_v49 = vld [vmem:[%s194_s11] sm:$0xff]  }
  0x19   : > { %v544_v50 = vunpack.c.l.bf16 %v543_v49  ;;  %v545_v51 = vunpack.c.h.bf16 %v543_v49 }
  0x1a   : > { %330 = vmatpush.bf16.msra.mxu0 %v458_v44 }
  0x1b   : > { %344 = vmatpush.bf16.msra.mxu1 %v462_v45  ;;  %358 = vmatpush.bf16.msra.mxu2 %v466_v46  ;;  %v212_v53 = vmul.f32 %v554_v48, %v544_v50  ;;  %v213_v54 = vmul.f32 %v554_v48, %v545_v51 }
  0x1c   : > { %372 = vmatpush.bf16.msra.mxu3 %v470_v47 }
  0x1d   : > { %v218_v55 = vadd.f32 %v555_v52, %v212_v53  ;;  %v219_v56 = vadd.f32 %v555_v52, %v213_v54 }
  0x1f   : > { %v220_v57 = vmax.f32 %v218_v55, 0.0  ;;  %v221_v58 = vmax.f32 %v219_v56, 0.0 }
  0x21   : > { %v222_v59 = vpack.c.bf16 %v221_v58, %v220_v57 }
  0x23   : > { %519 = vmatmul.msk.bf16.vlgmr.msra.gmra.mxu0 %vm319_vm0, %v222_v59  ;;  %520 = vmatmul.msk.bf16.vlgmr.msra.gmra.mxu1 %vm319_vm0, %v222_v59 }
  0x24   : > { %521 = vmatmul.msk.bf16.vlgmr.msra.gmra.mxu2 %vm319_vm0, %v222_v59  ;;  %522 = vmatmul.msk.bf16.vlgmr.msra.gmra.mxu3 %vm319_vm0, %v222_v59 }
  0xa0   : > { %v332_v60 = vpop.f32.mrf.mxu0  ;;  %v346_v61 = vpop.f32.mrf.mxu1 }
  0xa1   : > { %v379_v62 = vpack.c.bf16 %v346_v61, %v332_v60 }
  0xa3   : > { %383 = vst [vmem:[%s201_s20] sm:$0xff] %v379_v62 }
  0xa7   : > { %v360_v63 = vpop.f32.mrf.mxu2  ;;  %v374_v0 = vpop.f32.mrf.mxu3 }
  0xa8   : > { %v380_v1 = vpack.c.bf16 %v374_v0, %v360_v63  ;;  %v334_v2 = vpop.f32.mrf.mxu0  ;;  %v348_v3 = vpop.f32.mrf.mxu1 }
  0xa9   : > { %v381_v4 = vpack.c.bf16 %v348_v3, %v334_v2 }
  0xaa   : > { %384 = vst [vmem:[%s201_s20 + $0x8] sm:$0xff] %v380_v1 }
  0xab   : > { %385 = vst [vmem:[%s201_s20 + $0x10] sm:$0xff] %v381_v4 }
  0xaf   : > { %v362_v5 = vpop.f32.mrf.mxu2  ;;  %v376_v6 = vpop.f32.mrf.mxu3 }
  0xb0   : > { %v382_v7 = vpack.c.bf16 %v376_v6, %v362_v5 }
  0xb2   : > { %386 = vst [vmem:[%s201_s20 + $0x18] sm:$0xff] %v382_v7 }
  0xb3 PF: > { %s14_s15 = sadd.s32 1, %s562_s15  }
  0xb4   : > { %p11_p4 = scmp.ge.s32.totalorder %s14_s15, 4  }
  0xb6   :  { %13 = sbr.rel (!%p11_p4) target bundleno = 1 (0x1), region = 66 }

// kernel: generator_forward.4
= control target key start
LH: loop header
LB: loop body
LE: loop exit
PB: predicated region body
PF: predicated region fallthrough
CT: control target
= control target key end

     0   :  { %vm605_vm0 = vcmask 1040384   ;;  %vm607_vm1 = vcmask 1042434   ;;  %vm611_vm2 = vcmask 1044484   ;;  %vm609_vm3 = vcmask 1041408   ;;  %s1542_s1 = inlined_call_operand.vmem [shape: bf16[128,1024], index: 1, kind: input, shape index: {}]   ;;  %s1543_s0 = inlined_call_operand.vmem [shape: bf16[16,128], index: 0, kind: input, shape index: {}]   ;;  %s1544_s2 = inlined_call_operand.vmem [shape: bf16[16,1024], index: 2, kind: output, shape index: {0}]   ;;  %s1545_s3 = inlined_call_operand.vmem [shape: f32[1,1,1024], index: 3, kind: output, shape index: {1}]   ;;  %s1546_s4 = inlined_call_operand.vmem [shape: f32[1,1,1024], index: 4, kind: output, shape index: {2}]  }
   0x1   :  { %v959_v0 = vld [vmem:[%s1542_s1 + $0x1c0] sm:$0xf]  ;;  %v1046_v2 = vld [vmem:[%s1542_s1 + $0x1c4] sm:$0xf]  ;;  %v967_v5 = vld [vmem:[%s1542_s1 + $0x1c8] sm:$0xf] }
   0x2   :  { %v1050_v1 = vld [vmem:[%s1542_s1 + $0x1dc] sm:$0xf0]  ;;  %v961_v4 = vld [vmem:[%s1542_s1 + $0x1e0] sm:$0xf0]  ;;  %v1051_v6 = vld [vmem:[%s1542_s1 + $0x1e4] sm:$0xf0] }
   0x3   :  { %v960_v3 = vor.u32 %v1050_v1, %v959_v0  ;;  %v964_v7 = vor.u32 %v1046_v2, %v961_v4  ;;  %v968_v8 = vor.u32 %v1051_v6, %v967_v5  ;;  %v1047_v9 = vld [vmem:[%s1542_s1 + $0x1cc] sm:$0xf]  ;;  %v927_v11 = vld [vmem:[%s1542_s1 + $0x180] sm:$0xf]  ;;  %v1038_v14 = vld [vmem:[%s1542_s1 + $0x184] sm:$0xf] }
   0x4   :  { %v969_v10 = vld [vmem:[%s1542_s1 + $0x1e8] sm:$0xf0]  ;;  %v1042_v13 = vld [vmem:[%s1542_s1 + $0x19c] sm:$0xf0]  ;;  %v929_v15 = vld [vmem:[%s1542_s1 + $0x1a0] sm:$0xf0] }
   0x5   :  { %406 = vmatpush.bf16.msra.mxu0 %v960_v3  ;;  %v972_v12 = vor.u32 %v1047_v9, %v969_v10  ;;  %420 = vmatpush.bf16.msra.mxu1 %v964_v7  ;;  %v928_v16 = vor.u32 %v1042_v13, %v927_v11  ;;  %v932_v17 = vor.u32 %v1038_v14, %v929_v15  ;;  %v935_v18 = vld [vmem:[%s1542_s1 + $0x188] sm:$0xf]  ;;  %v1039_v20 = vld [vmem:[%s1542_s1 + $0x18c] sm:$0xf]  ;;  %v895_v23 = vld [vmem:[%s1542_s1 + $0x140] sm:$0xf] }
   0x6   :  { %434 = vmatpush.bf16.msra.mxu2 %v968_v8  ;;  %v1043_v19 = vld [vmem:[%s1542_s1 + $0x1a4] sm:$0xf0]  ;;  %v937_v22 = vld [vmem:[%s1542_s1 + $0x1a8] sm:$0xf0]  ;;  %v1034_v24 = vld [vmem:[%s1542_s1 + $0x15c] sm:$0xf0] }
   0x7   :  { %448 = vmatpush.bf16.msra.mxu3 %v972_v12  ;;  %v936_v21 = vor.u32 %v1043_v19, %v935_v18  ;;  %v940_v25 = vor.u32 %v1039_v20, %v937_v22  ;;  %v1030_v26 = vld [vmem:[%s1542_s1 + $0x144] sm:$0xf]  ;;  %v903_v28 = vld [vmem:[%s1542_s1 + $0x148] sm:$0xf]  ;;  %v896_v29 = vor.u32 %v1034_v24, %v895_v23  ;;  %v1031_v31 = vld [vmem:[%s1542_s1 + $0x14c] sm:$0xf] }
   0x8   :  { %v897_v27 = vld [vmem:[%s1542_s1 + $0x160] sm:$0xf0]  ;;  %v1035_v30 = vld [vmem:[%s1542_s1 + $0x164] sm:$0xf0]  ;;  %v905_v32 = vld [vmem:[%s1542_s1 + $0x168] sm:$0xf0] }
   0x9   :  { %407 = vmatpush.bf16.msra.mxu0 %v928_v16  ;;  %421 = vmatpush.bf16.msra.mxu1 %v932_v17  ;;  %v900_v33 = vor.u32 %v1030_v26, %v897_v27  ;;  %v904_v34 = vor.u32 %v1035_v30, %v903_v28  ;;  %v863_v35 = vld [vmem:[%s1542_s1 + $0x100] sm:$0xf]  ;;  %v1022_v37 = vld [vmem:[%s1542_s1 + $0x104] sm:$0xf]  ;;  %v908_v38 = vor.u32 %v1031_v31, %v905_v32  ;;  %v871_v40 = vld [vmem:[%s1542_s1 + $0x108] sm:$0xf] }
   0xa   :  { %435 = vmatpush.bf16.msra.mxu2 %v936_v21  ;;  %v1026_v36 = vld [vmem:[%s1542_s1 + $0x11c] sm:$0xf0]  ;;  %v865_v39 = vld [vmem:[%s1542_s1 + $0x120] sm:$0xf0]  ;;  %v1027_v41 = vld [vmem:[%s1542_s1 + $0x124] sm:$0xf0] }
   0xb   :  { %449 = vmatpush.bf16.msra.mxu3 %v940_v25  ;;  %v1023_v42 = vld [vmem:[%s1542_s1 + $0x10c] sm:$0xf]  ;;  %v864_v44 = vor.u32 %v1026_v36, %v863_v35  ;;  %v868_v45 = vor.u32 %v1022_v37, %v865_v39  ;;  %v872_v46 = vor.u32 %v1027_v41, %v871_v40  ;;  %v831_v47 = vld [vmem:[%s1542_s1 + $0xc0] sm:$0xf]  ;;  %v1014_v49 = vld [vmem:[%s1542_s1 + $0xc4] sm:$0xf] }
   0xc   :  { %v873_v43 = vld [vmem:[%s1542_s1 + $0x128] sm:$0xf0]  ;;  %v1018_v48 = vld [vmem:[%s1542_s1 + $0xdc] sm:$0xf0]  ;;  %v833_v51 = vld [vmem:[%s1542_s1 + $0xe0] sm:$0xf0] }
   0xd   :  { %408 = vmatpush.bf16.msra.mxu0 %v896_v29  ;;  %422 = vmatpush.bf16.msra.mxu1 %v900_v33  ;;  %v876_v50 = vor.u32 %v1023_v42, %v873_v43  ;;  %v839_v52 = vld [vmem:[%s1542_s1 + $0xc8] sm:$0xf]  ;;  %v1015_v54 = vld [vmem:[%s1542_s1 + $0xcc] sm:$0xf]  ;;  %v832_v56 = vor.u32 %v1018_v48, %v831_v47  ;;  %v836_v57 = vor.u32 %v1014_v49, %v833_v51  ;;  %v799_v59 = vld [vmem:[%s1542_s1 + $0x80] sm:$0xf] }
   0xe   :  { %436 = vmatpush.bf16.msra.mxu2 %v904_v34  ;;  %v1019_v53 = vld [vmem:[%s1542_s1 + $0xe4] sm:$0xf0]  ;;  %v841_v55 = vld [vmem:[%s1542_s1 + $0xe8] sm:$0xf0]  ;;  %v1010_v60 = vld [vmem:[%s1542_s1 + $0x9c] sm:$0xf0] }
   0xf   :  { %450 = vmatpush.bf16.msra.mxu3 %v908_v38  ;;  %v840_v58 = vor.u32 %v1019_v53, %v839_v52  ;;  %v1006_v61 = vld [vmem:[%s1542_s1 + $0x84] sm:$0xf]  ;;  %v844_v62 = vor.u32 %v1015_v54, %v841_v55  ;;  %v807_v0 = vld [vmem:[%s1542_s1 + $0x88] sm:$0xf]  ;;  %v1007_v2 = vld [vmem:[%s1542_s1 + $0x8c] sm:$0xf]  ;;  %v800_v4 = vor.u32 %v1010_v60, %v799_v59 }
  0x10   :  { %v801_v63 = vld [vmem:[%s1542_s1 + $0xa0] sm:$0xf0]  ;;  %v1011_v1 = vld [vmem:[%s1542_s1 + $0xa4] sm:$0xf0]  ;;  %v809_v3 = vld [vmem:[%s1542_s1 + $0xa8] sm:$0xf0] }
  0x11   :  { %409 = vmatpush.bf16.msra.mxu0 %v864_v44  ;;  %423 = vmatpush.bf16.msra.mxu1 %v868_v45  ;;  %v804_v5 = vor.u32 %v1006_v61, %v801_v63  ;;  %v808_v6 = vor.u32 %v1011_v1, %v807_v0  ;;  %v767_v7 = vld [vmem:[%s1542_s1 + $0x40] sm:$0xf]  ;;  %v998_v9 = vld [vmem:[%s1542_s1 + $0x44] sm:$0xf]  ;;  %v812_v10 = vor.u32 %v1007_v2, %v809_v3  ;;  %v775_v12 = vld [vmem:[%s1542_s1 + $0x48] sm:$0xf] }
  0x12   :  { %437 = vmatpush.bf16.msra.mxu2 %v872_v46  ;;  %v1002_v8 = vld [vmem:[%s1542_s1 + $0x5c] sm:$0xf0]  ;;  %v769_v11 = vld [vmem:[%s1542_s1 + $0x60] sm:$0xf0]  ;;  %v1003_v13 = vld [vmem:[%s1542_s1 + $0x64] sm:$0xf0] }
  0x13   :  { %451 = vmatpush.bf16.msra.mxu3 %v876_v50  ;;  %v999_v14 = vld [vmem:[%s1542_s1 + $0x4c] sm:$0xf]  ;;  %v768_v16 = vor.u32 %v1002_v8, %v767_v7  ;;  %v735_v17 = vld [vmem:[%s1542_s1] sm:$0xf]  ;;  %v772_v19 = vor.u32 %v998_v9, %v769_v11  ;;  %v776_v20 = vor.u32 %v1003_v13, %v775_v12  ;;  %v990_v21 = vld [vmem:[%s1542_s1 + $0x4] sm:$0xf] }
  0x14   :  { %v777_v15 = vld [vmem:[%s1542_s1 + $0x68] sm:$0xf0]  ;;  %v994_v18 = vld [vmem:[%s1542_s1 + $0x1c] sm:$0xf0]  ;;  %v737_v22 = vld [vmem:[%s1542_s1 + $0x20] sm:$0xf0] }
  0x15   :  { %410 = vmatpush.bf16.msra.mxu0 %v832_v56  ;;  %424 = vmatpush.bf16.msra.mxu1 %v836_v57  ;;  %v743_v23 = vld [vmem:[%s1542_s1 + $0x8] sm:$0xf]  ;;  %v780_v24 = vor.u32 %v999_v14, %v777_v15  ;;  %v991_v26 = vld [vmem:[%s1542_s1 + $0xc] sm:$0xf]  ;;  %v975_v28 = vld [vmem:[%s1542_s1 + $0x1d0] sm:$0xf]  ;;  %v736_v31 = vor.u32 %v994_v18, %v735_v17  ;;  %v740_v35 = vor.u32 %v990_v21, %v737_v22 }
  0x16   :  { %438 = vmatpush.bf16.msra.mxu2 %v840_v58  ;;  %v995_v25 = vld [vmem:[%s1542_s1 + $0x24] sm:$0xf0]  ;;  %v745_v27 = vld [vmem:[%s1542_s1 + $0x28] sm:$0xf0]  ;;  %v1052_v29 = vld [vmem:[%s1542_s1 + $0x1ec] sm:$0xf0] }
  0x17   :  { %452 = vmatpush.bf16.msra.mxu3 %v844_v62  ;;  %v1048_v30 = vld [vmem:[%s1542_s1 + $0x1d4] sm:$0xf]  ;;  %v983_v33 = vld [vmem:[%s1542_s1 + $0x1d8] sm:$0xf]  ;;  %v744_v36 = vor.u32 %v995_v25, %v743_v23  ;;  %v1049_v37 = vld [vmem:[%s1542_s1 + $0x1dc] sm:$0xf]  ;;  %v748_v39 = vor.u32 %v991_v26, %v745_v27  ;;  %v976_v40 = vor.u32 %v1052_v29, %v975_v28 }
  0x18   :  { %v977_v32 = vld [vmem:[%s1542_s1 + $0x1f0] sm:$0xf0]  ;;  %v1053_v34 = vld [vmem:[%s1542_s1 + $0x1f4] sm:$0xf0]  ;;  %v985_v38 = vld [vmem:[%s1542_s1 + $0x1f8] sm:$0xf0] }
  0x19   :  { %411 = vmatpush.bf16.msra.mxu0 %v800_v4  ;;  %425 = vmatpush.bf16.msra.mxu1 %v804_v5  ;;  %v1298_v41 = vld [vmem:[%s1543_s0] sm:$0xff]  ;;  %v980_v42 = vor.u32 %v1048_v30, %v977_v32  ;;  %v984_v43 = vor.u32 %v1053_v34, %v983_v33  ;;  %v943_v44 = vld [vmem:[%s1542_s1 + $0x190] sm:$0xf]  ;;  %v1040_v46 = vld [vmem:[%s1542_s1 + $0x194] sm:$0xf]  ;;  %v988_v47 = vor.u32 %v1049_v37, %v985_v38  ;;  %vm613_vm4 = vcmask 1046534  }
  0x1a   :  { %439 = vmatpush.bf16.msra.mxu2 %v808_v6  ;;  %v1044_v45 = vld [vmem:[%s1542_s1 + $0x1ac] sm:$0xf0]  ;;  %v945_v48 = vld [vmem:[%s1542_s1 + $0x1b0] sm:$0xf0]  ;;  %v951_v49 = vld [vmem:[%s1542_s1 + $0x198] sm:$0xf] }
  0x1b   :  { %453 = vmatpush.bf16.msra.mxu3 %v812_v10  ;;  %v1045_v50 = vld [vmem:[%s1542_s1 + $0x1b4] sm:$0xf0]  ;;  %v1041_v51 = vld [vmem:[%s1542_s1 + $0x19c] sm:$0xf]  ;;  %v944_v53 = vor.u32 %v1044_v45, %v943_v44  ;;  %v948_v54 = vor.u32 %v1040_v46, %v945_v48  ;;  %v911_v56 = vld [vmem:[%s1542_s1 + $0x150] sm:$0xf] }
  0x1c   :  { %v953_v52 = vld [vmem:[%s1542_s1 + $0x1b8] sm:$0xf0]  ;;  %v952_v55 = vor.u32 %v1045_v50, %v951_v49  ;;  %v1036_v57 = vld [vmem:[%s1542_s1 + $0x16c] sm:$0xf0]  ;;  %v1032_v58 = vld [vmem:[%s1542_s1 + $0x154] sm:$0xf] }
  0x1d   :  { %412 = vmatpush.bf16.msra.mxu0 %v768_v16  ;;  %426 = vmatpush.bf16.msra.mxu1 %v772_v19  ;;  %v956_v59 = vor.u32 %v1041_v51, %v953_v52  ;;  %v913_v60 = vld [vmem:[%s1542_s1 + $0x170] sm:$0xf0]  ;;  %v919_v61 = vld [vmem:[%s1542_s1 + $0x158] sm:$0xf]  ;;  %v1033_v63 = vld [vmem:[%s1542_s1 + $0x15c] sm:$0xf]  ;;  %v912_v1 = vor.u32 %v1036_v57, %v911_v56 }
  0x1e   :  { %440 = vmatpush.bf16.msra.mxu2 %v776_v20  ;;  %v1037_v62 = vld [vmem:[%s1542_s1 + $0x174] sm:$0xf0]  ;;  %v921_v0 = vld [vmem:[%s1542_s1 + $0x178] sm:$0xf0]  ;;  %v916_v2 = vor.u32 %v1032_v58, %v913_v60  ;;  %v879_v4 = vld [vmem:[%s1542_s1 + $0x110] sm:$0xf] }
  0x1f   :  { %454 = vmatpush.bf16.msra.mxu3 %v780_v24  ;;  %v920_v3 = vor.u32 %v1037_v62, %v919_v61  ;;  %v1028_v5 = vld [vmem:[%s1542_s1 + $0x12c] sm:$0xf0]  ;;  %v1024_v6 = vld [vmem:[%s1542_s1 + $0x114] sm:$0xf]  ;;  %v924_v7 = vor.u32 %v1033_v63, %v921_v0  ;;  %v887_v9 = vld [vmem:[%s1542_s1 + $0x118] sm:$0xf] }
  0x20   :  { %v881_v8 = vld [vmem:[%s1542_s1 + $0x130] sm:$0xf0]  ;;  %v1029_v10 = vld [vmem:[%s1542_s1 + $0x134] sm:$0xf0]  ;;  %v1025_v11 = vld [vmem:[%s1542_s1 + $0x11c] sm:$0xf]  ;;  %v880_v13 = vor.u32 %v1028_v5, %v879_v4 }
  0x21   :  { %413 = vmatpush.bf16.msra.mxu0 %v736_v31  ;;  %427 = vmatpush.bf16.msra.mxu1 %v740_v35  ;;  %v889_v12 = vld [vmem:[%s1542_s1 + $0x138] sm:$0xf0]  ;;  %v884_v14 = vor.u32 %v1024_v6, %v881_v8  ;;  %v888_v15 = vor.u32 %v1029_v10, %v887_v9  ;;  %v847_v16 = vld [vmem:[%s1542_s1 + $0xd0] sm:$0xf]  ;;  %v1016_v18 = vld [vmem:[%s1542_s1 + $0xd4] sm:$0xf] }
  0x22   :  { %441 = vmatpush.bf16.msra.mxu2 %v744_v36  ;;  %v1020_v17 = vld [vmem:[%s1542_s1 + $0xec] sm:$0xf0]  ;;  %v892_v19 = vor.u32 %v1025_v11, %v889_v12  ;;  %v849_v20 = vld [vmem:[%s1542_s1 + $0xf0] sm:$0xf0]  ;;  %v855_v21 = vld [vmem:[%s1542_s1 + $0xd8] sm:$0xf] }
  0x23   :  { %455 = vmatpush.bf16.msra.mxu3 %v748_v39  ;;  %v1021_v22 = vld [vmem:[%s1542_s1 + $0xf4] sm:$0xf0]  ;;  %v1017_v23 = vld [vmem:[%s1542_s1 + $0xdc] sm:$0xf]  ;;  %v848_v25 = vor.u32 %v1020_v17, %v847_v16  ;;  %v852_v26 = vor.u32 %v1016_v18, %v849_v20  ;;  %v815_v28 = vld [vmem:[%s1542_s1 + $0x90] sm:$0xf] }
  0x24   :  { %428 = vmatmul.bf16.vlgmr.msra.gmra.mxu1 %v1298_v41  ;;  %414 = vmatmul.bf16.vlgmr.msra.gmra.mxu0 %v1298_v41  ;;  %v857_v24 = vld [vmem:[%s1542_s1 + $0xf8] sm:$0xf0]  ;;  %v856_v27 = vor.u32 %v1021_v22, %v855_v21  ;;  %v1012_v29 = vld [vmem:[%s1542_s1 + $0xac] sm:$0xf0]  ;;  %v1008_v30 = vld [vmem:[%s1542_s1 + $0x94] sm:$0xf] }
  0x25   :  { %462 = vmatpush.bf16.msrb.mxu0 %v976_v40  ;;  %476 = vmatpush.bf16.msrb.mxu1 %v980_v42  ;;  %v860_v31 = vor.u32 %v1017_v23, %v857_v24  ;;  %v817_v32 = vld [vmem:[%s1542_s1 + $0xb0] sm:$0xf0]  ;;  %v823_v33 = vld [vmem:[%s1542_s1 + $0x98] sm:$0xf]  ;;  %v1009_v35 = vld [vmem:[%s1542_s1 + $0x9c] sm:$0xf]  ;;  %v816_v37 = vor.u32 %v1012_v29, %v815_v28 }
  0x26   :  { %490 = vmatpush.bf16.msrb.mxu2 %v984_v43  ;;  %456 = vmatmul.bf16.vlgmr.msra.gmra.mxu3 %v1298_v41  ;;  %v1013_v34 = vld [vmem:[%s1542_s1 + $0xb4] sm:$0xf0]  ;;  %v825_v36 = vld [vmem:[%s1542_s1 + $0xb8] sm:$0xf0]  ;;  %v820_v38 = vor.u32 %v1008_v30, %v817_v32  ;;  %v783_v40 = vld [vmem:[%s1542_s1 + $0x50] sm:$0xf] }
  0x27   :  { %504 = vmatpush.bf16.msrb.mxu3 %v988_v47  ;;  %442 = vmatmul.bf16.vlgmr.msra.gmra.mxu2 %v1298_v41  ;;  %v824_v39 = vor.u32 %v1013_v34, %v823_v33  ;;  %v1004_v42 = vld [vmem:[%s1542_s1 + $0x6c] sm:$0xf0]  ;;  %v1000_v43 = vld [vmem:[%s1542_s1 + $0x54] sm:$0xf]  ;;  %v828_v44 = vor.u32 %v1009_v35, %v825_v36  ;;  %v791_v46 = vld [vmem:[%s1542_s1 + $0x58] sm:$0xf] }
  0x28   :  { %v785_v45 = vld [vmem:[%s1542_s1 + $0x70] sm:$0xf0]  ;;  %v1005_v47 = vld [vmem:[%s1542_s1 + $0x74] sm:$0xf0]  ;;  %v1001_v48 = vld [vmem:[%s1542_s1 + $0x5c] sm:$0xf]  ;;  %v784_v50 = vor.u32 %v1004_v42, %v783_v40 }
  0x29   :  { %463 = vmatpush.bf16.msrb.mxu0 %v944_v53  ;;  %477 = vmatpush.bf16.msrb.mxu1 %v948_v54  ;;  %v793_v49 = vld [vmem:[%s1542_s1 + $0x78] sm:$0xf0]  ;;  %v788_v51 = vor.u32 %v1000_v43, %v785_v45  ;;  %v792_v52 = vor.u32 %v1005_v47, %v791_v46  ;;  %v751_v53 = vld [vmem:[%s1542_s1 + $0x10] sm:$0xf]  ;;  %v753_v57 = vld [vmem:[%s1542_s1 + $0x30] sm:$0xf0] }
  0x2a   :  { %491 = vmatpush.bf16.msrb.mxu2 %v952_v55  ;;  %v996_v54 = vld [vmem:[%s1542_s1 + $0x2c] sm:$0xf0]  ;;  %v992_v55 = vld [vmem:[%s1542_s1 + $0x14] sm:$0xf]  ;;  %v796_v56 = vor.u32 %v1001_v48, %v793_v49  ;;  %v759_v58 = vld [vmem:[%s1542_s1 + $0x18] sm:$0xf] }
  0x2b   :  { %505 = vmatpush.bf16.msrb.mxu3 %v956_v59  ;;  %v997_v59 = vld [vmem:[%s1542_s1 + $0x34] sm:$0xf0]  ;;  %v993_v60 = vld [vmem:[%s1542_s1 + $0x1c] sm:$0xf]  ;;  %v752_v62 = vor.u32 %v996_v54, %v751_v53  ;;  %v756_v63 = vor.u32 %v992_v55, %v753_v57  ;;  %vm615_vm5 = vcmask 1045508   ;;  %vm617_vm6 = vcmask 1043456  }
  0x2c   :  { %v761_v61 = vld [vmem:[%s1542_s1 + $0x38] sm:$0xf0]  ;;  %v760_v0 = vor.u32 %v997_v59, %v759_v58 }
  0x2d   :  { %464 = vmatpush.bf16.msrb.mxu0 %v912_v1  ;;  %478 = vmatpush.bf16.msrb.mxu1 %v916_v2  ;;  %v764_v1 = vor.u32 %v993_v60, %v761_v61 }
  0x2e   :  { %492 = vmatpush.bf16.msrb.mxu2 %v920_v3 }
  0x2f   :  { %506 = vmatpush.bf16.msrb.mxu3 %v924_v7 }
  0x31   :  { %465 = vmatpush.bf16.msrb.mxu0 %v880_v13  ;;  %479 = vmatpush.bf16.msrb.mxu1 %v884_v14 }
  0x32   :  { %493 = vmatpush.bf16.msrb.mxu2 %v888_v15 }
  0x33   :  { %507 = vmatpush.bf16.msrb.mxu3 %v892_v19 }
  0x35   :  { %466 = vmatpush.bf16.msrb.mxu0 %v848_v25  ;;  %480 = vmatpush.bf16.msrb.mxu1 %v852_v26 }
  0x36   :  { %494 = vmatpush.bf16.msrb.mxu2 %v856_v27 }
  0x37   :  { %508 = vmatpush.bf16.msrb.mxu3 %v860_v31 }
  0x39   :  { %467 = vmatpush.bf16.msrb.mxu0 %v816_v37  ;;  %481 = vmatpush.bf16.msrb.mxu1 %v820_v38 }
  0x3a   :  { %495 = vmatpush.bf16.msrb.mxu2 %v824_v39 }
  0x3b   :  { %509 = vmatpush.bf16.msrb.mxu3 %v828_v44 }
  0x3d   :  { %468 = vmatpush.bf16.msrb.mxu0 %v784_v50  ;;  %482 = vmatpush.bf16.msrb.mxu1 %v788_v51 }
  0x3e   :  { %496 = vmatpush.bf16.msrb.mxu2 %v792_v52 }
  0x3f   :  { %510 = vmatpush.bf16.msrb.mxu3 %v796_v56 }
  0x41   :  { %469 = vmatpush.bf16.msrb.mxu0 %v752_v62  ;;  %483 = vmatpush.bf16.msrb.mxu1 %v756_v63 }
  0x42   :  { %497 = vmatpush.bf16.msrb.mxu2 %v760_v0 }
  0x43   :  { %511 = vmatpush.bf16.msrb.mxu3 %v764_v1 }
  0x44   :  { %470 = vmatmul.bf16.vlgmr.msrb.gmra.mxu0 %v1298_v41  ;;  %484 = vmatmul.bf16.vlgmr.msrb.gmra.mxu1 %v1298_v41 }
  0x45   :  { %498 = vmatmul.bf16.vlgmr.msrb.gmra.mxu2 %v1298_v41 }
  0x46   :  { %512 = vmatmul.bf16.vlgmr.msrb.gmra.mxu3 %v1298_v41 }
  0xa1   :  { %v429_v2 = vpop.f32.mrf.mxu1  ;;  %v415_v3 = vpop.f32.mrf.mxu0 }
  0xa2   :  { %v518_v4 = vpack.c.bf16 %v429_v2, %v415_v3  ;;  %v622_v8 = vmul.f32 %v429_v2, %v429_v2  ;;  %v621_v18 = vmul.f32 %v415_v3, %v415_v3 }
  0xa4   :  { %526 = vst [vmem:[%s1544_s2] sm:$0xff] %v518_v4 }
  0xa9   :  { %v457_v6 = vpop.f32.mrf.mxu3  ;;  %v431_v9 = vpop.f32.mrf.mxu1 }
  0xaa   :  { %v443_v5 = vpop.f32.mrf.mxu2  ;;  %v541_v10 = vadd.f32 %v431_v9, %v429_v2  ;;  %v630_v11 = vmul.f32 %v431_v9, %v431_v9  ;;  %v417_v12 = vpop.f32.mrf.mxu0  ;;  %v624_v32 = vmul.f32 %v457_v6, %v457_v6 }
  0xab   :  { %v519_v7 = vpack.c.bf16 %v457_v6, %v443_v5  ;;  %v522_v14 = vpack.c.bf16 %v431_v9, %v417_v12  ;;  %v534_v15 = vadd.f32 %v417_v12, %v415_v3  ;;  %v629_v19 = vmul.f32 %v417_v12, %v417_v12 }
  0xac   :  { %v542_v41 = vrot.slane %v541_v10, 4  ;;  %v644_v13 = vadd.f32 %v630_v11, %v622_v8  ;;  %v623_v24 = vmul.f32 %v443_v5, %v443_v5 }
  0xad   :  { %527 = vst [vmem:[%s1544_s2 + $0x8] sm:$0xff] %v519_v7  ;;  %v535_v23 = vrot.slane %v534_v15, 4  ;;  %v637_v25 = vadd.f32 %v629_v19, %v621_v18 }
  0xae   :  { %530 = vst [vmem:[%s1544_s2 + $0x20] sm:$0xff] %v522_v14  ;;  %v543_v21 = vadd.f32 %v542_v41, %v541_v10  ;;  %v645_v22 = vrot.slane %v644_v13, 4 }
  0xaf   :  { %v536_v30 = vadd.f32 %v535_v23, %v534_v15  ;;  %v638_v33 = vrot.slane %v637_v25, 4 }
  0xb0   :  { %v544_v28 = vrot.slane %v543_v21, 2  ;;  %v646_v29 = vadd.f32 %v645_v22, %v644_v13 }
  0xb1   :  { %v459_v17 = vpop.f32.mrf.mxu3  ;;  %v537_v39 = vrot.slane %v536_v30, 2  ;;  %v639_v42 = vadd.f32 %v638_v33, %v637_v25 }
  0xb2   :  { %v445_v16 = vpop.f32.mrf.mxu2  ;;  %v555_v31 = vadd.f32 %v459_v17, %v457_v6  ;;  %v632_v36 = vmul.f32 %v459_v17, %v459_v17  ;;  %v545_v37 = vadd.f32 %v544_v28, %v543_v21  ;;  %v647_v38 = vrot.slane %v646_v29, 2 }
  0xb3   :  { %v523_v20 = vpack.c.bf16 %v459_v17, %v445_v16  ;;  %v548_v26 = vadd.f32 %v445_v16, %v443_v5  ;;  %v631_v27 = vmul.f32 %v445_v16, %v445_v16  ;;  %v538_v48 = vadd.f32 %v537_v39, %v536_v30 }
  0xb4   :  { %v556_v40 = vrot.slane %v555_v31, 4  ;;  %v658_v45 = vadd.f32 %v632_v36, %v624_v32  ;;  %v546_v46 = vrot.slane %v545_v37, 1  ;;  %v648_v47 = vadd.f32 %v647_v38, %v646_v29 }
  0xb5   :  { %531 = vst [vmem:[%s1544_s2 + $0x28] sm:$0xff] %v523_v20  ;;  %v549_v34 = vrot.slane %v548_v26, 4  ;;  %v651_v35 = vadd.f32 %v631_v27, %v623_v24  ;;  %v640_v53 = vrot.slane %v639_v42, 2  ;;  %v539_v59 = vrot.slane %v538_v48, 1 }
  0xb6   :  { %v557_v49 = vadd.f32 %v556_v40, %v555_v31  ;;  %v659_v56 = vrot.slane %v658_v45, 4  ;;  %v547_v57 = vadd.f32 %v546_v46, %v545_v37  ;;  %v649_v58 = vrot.slane %v648_v47, 1 }
  0xb7   :  { %v550_v43 = vadd.f32 %v549_v34, %v548_v26  ;;  %v652_v44 = vrot.slane %v651_v35, 4  ;;  %v1491_v61 = vadd.f32 %v640_v53, %v639_v42  ;;  %v540_v4 = vadd.f32 %v539_v59, %v538_v48 }
  0xb8   :  { %v558_v60 = vrot.slane %v557_v49, 2  ;;  %v660_v0 = vadd.f32 %v659_v56, %v658_v45  ;;  %v598_v2 = vrot.slane %v547_v57, 7  ;;  %v1495_v3 = vadd.f32 %v649_v58, %v648_v47 }
  0xb9   :  { %v551_v54 = vrot.slane %v550_v43, 2  ;;  %v653_v55 = vadd.f32 %v652_v44, %v651_v35  ;;  %v642_v19 = vrot.slane %v1491_v61, 1 }
  0xba   :  { %v1497_v5 = vadd.f32 %v558_v60, %v557_v49  ;;  %v661_v16 = vrot.slane %v660_v0, 2  ;;  %v701_v23 = vrot.slane %v1495_v3, 7  ;;  %v1509_v27 = vsel %vm605_vm0, %v540_v4, %v598_v2 }
  0xbb   :  { %v1493_v62 = vadd.f32 %v551_v54, %v550_v43  ;;  %v654_v63 = vrot.slane %v653_v55, 2 }
  0xbc   :  { %v560_v28 = vrot.slane %v1497_v5, 1  ;;  %v662_v31 = vadd.f32 %v661_v16, %v660_v0 }
  0xbd   :  { %v553_v20 = vrot.slane %v1493_v62, 1  ;;  %v655_v24 = vadd.f32 %v654_v63, %v653_v55 }
  0xbf   :  { %v554_v58 = vadd.f32 %v553_v20, %v1493_v62  ;;  %v656_v0 = vrot.slane %v655_v24, 1 }
  0xc1   :  { %v471_v50 = vpop.f32.mrf.mxu0  ;;  %v485_v51 = vpop.f32.mrf.mxu1  ;;  %v657_v16 = vadd.f32 %v656_v0, %v655_v24 }
  0xc2   :  { %v520_v52 = vpack.c.bf16 %v485_v51, %v471_v50  ;;  %v625_v8 = vmul.f32 %v471_v50, %v471_v50  ;;  %v626_v41 = vmul.f32 %v485_v51, %v485_v51 }
  0xc4   :  { %528 = vst [vmem:[%s1544_s2 + $0x10] sm:$0xff] %v520_v52 }
  0xc8   :  { %v499_v1 = vpop.f32.mrf.mxu2 }
  0xc9   :  { %v513_v6 = vpop.f32.mrf.mxu3  ;;  %v473_v7 = vpop.f32.mrf.mxu0  ;;  %v627_v32 = vmul.f32 %v499_v1, %v499_v1 }
  0xca   :  { %v521_v9 = vpack.c.bf16 %v513_v6, %v499_v1  ;;  %v562_v10 = vadd.f32 %v473_v7, %v471_v50  ;;  %v633_v11 = vmul.f32 %v473_v7, %v473_v7  ;;  %v487_v12 = vpop.f32.mrf.mxu1  ;;  %v628_v50 = vmul.f32 %v513_v6, %v513_v6 }
  0xcb   :  { %v524_v13 = vpack.c.bf16 %v487_v12, %v473_v7  ;;  %v569_v14 = vadd.f32 %v487_v12, %v485_v51  ;;  %v634_v15 = vmul.f32 %v487_v12, %v487_v12 }
  0xcc   :  { %529 = vst [vmem:[%s1544_s2 + $0x18] sm:$0xff] %v521_v9  ;;  %v563_v17 = vrot.slane %v562_v10, 4  ;;  %v665_v18 = vadd.f32 %v633_v11, %v625_v8 }
  0xcd   :  { %532 = vst [vmem:[%s1544_s2 + $0x30] sm:$0xff] %v524_v13  ;;  %v570_v21 = vrot.slane %v569_v14, 4  ;;  %v672_v22 = vadd.f32 %v634_v15, %v626_v41  ;;  %v599_v13 = vrot.slane %v554_v58, 6 }
  0xce   :  { %v564_v25 = vadd.f32 %v563_v17, %v562_v10  ;;  %v666_v26 = vrot.slane %v665_v18, 4 }
  0xcf   :  { %v571_v29 = vadd.f32 %v570_v21, %v569_v14  ;;  %v673_v30 = vrot.slane %v672_v22, 4 }
  0xd0   :  { %v565_v33 = vrot.slane %v564_v25, 2  ;;  %v667_v34 = vadd.f32 %v666_v26, %v665_v18  ;;  %v501_v35 = vpop.f32.mrf.mxu2 }
  0xd1   :  { %v572_v36 = vrot.slane %v571_v29, 2  ;;  %v674_v37 = vadd.f32 %v673_v30, %v672_v22  ;;  %v576_v38 = vadd.f32 %v501_v35, %v499_v1  ;;  %v635_v39 = vmul.f32 %v501_v35, %v501_v35  ;;  %v515_v40 = vpop.f32.mrf.mxu3 }
  0xd2   :  { %v566_v42 = vadd.f32 %v565_v33, %v564_v25  ;;  %v668_v43 = vrot.slane %v667_v34, 2  ;;  %v525_v44 = vpack.c.bf16 %v515_v40, %v501_v35  ;;  %v583_v45 = vadd.f32 %v515_v40, %v513_v6 }
  0xd3   :  { %v573_v46 = vadd.f32 %v572_v36, %v571_v29  ;;  %v675_v47 = vrot.slane %v674_v37, 2  ;;  %v577_v48 = vrot.slane %v576_v38, 4  ;;  %v679_v49 = vadd.f32 %v635_v39, %v627_v32 }
  0xd4   :  { %v567_v51 = vrot.slane %v566_v42, 1  ;;  %533 = vst [vmem:[%s1544_s2 + $0x38] sm:$0xff] %v525_v44  ;;  %v584_v52 = vrot.slane %v583_v45, 4  ;;  %v636_v53 = vmul.f32 %v515_v40, %v515_v40  ;;  %v669_v54 = vadd.f32 %v668_v43, %v667_v34 }
  0xd5   :  { %v574_v55 = vrot.slane %v573_v46, 1  ;;  %v578_v56 = vadd.f32 %v577_v48, %v576_v38  ;;  %v680_v57 = vrot.slane %v679_v49, 4  ;;  %v676_v59 = vadd.f32 %v675_v47, %v674_v37 }
  0xd6   :  { %v585_v60 = vadd.f32 %v584_v52, %v583_v45  ;;  %v686_v63 = vadd.f32 %v636_v53, %v628_v50  ;;  %v561_v1 = vadd.f32 %v560_v28, %v1497_v5  ;;  %v663_v6 = vrot.slane %v662_v31, 1 }
  0xd7   :  { %v579_v2 = vrot.slane %v578_v56, 2  ;;  %v681_v4 = vadd.f32 %v680_v57, %v679_v49  ;;  %v568_v7 = vadd.f32 %v567_v51, %v566_v42  ;;  %v670_v10 = vrot.slane %v669_v54, 1 }
  0xd8   :  { %v586_v8 = vrot.slane %v585_v60, 2  ;;  %v687_v9 = vrot.slane %v686_v63, 4  ;;  %v575_v11 = vadd.f32 %v574_v55, %v573_v46  ;;  %v677_v62 = vrot.slane %v676_v59, 1 }
  0xd9   :  { %v580_v12 = vadd.f32 %v579_v2, %v578_v56  ;;  %v682_v41 = vrot.slane %v681_v4, 2  ;;  %v600_v17 = vrot.slane %v561_v1, 5  ;;  %v664_v5 = vadd.f32 %v663_v6, %v662_v31 }
  0xda   :  { %v587_v14 = vadd.f32 %v586_v8, %v585_v60  ;;  %v688_v15 = vadd.f32 %v687_v9, %v686_v63  ;;  %v601_v21 = vrot.slane %v568_v7, 4  ;;  %v671_v26 = vadd.f32 %v670_v10, %v669_v54 }
  0xdb   :  { %v581_v18 = vrot.slane %v580_v12, 1  ;;  %v683_v20 = vadd.f32 %v682_v41, %v681_v4  ;;  %v602_v28 = vrot.slane %v575_v11, 3  ;;  %v678_v32 = vadd.f32 %v677_v62, %v676_v59 }
  0xdc   :  { %v588_v22 = vrot.slane %v587_v14, 1  ;;  %v689_v25 = vrot.slane %v688_v15, 2  ;;  %v702_v35 = vrot.slane %v657_v16, 6  ;;  %v608_v24 = vsel %vm607_vm1, %v599_v13, %v600_v17 }
  0xdd   :  { %v582_v29 = vadd.f32 %v581_v18, %v580_v12  ;;  %v684_v30 = vrot.slane %v683_v20, 1  ;;  %v703_v38 = vrot.slane %v664_v5, 5  ;;  %v643_v40 = vadd.f32 %v642_v19, %v1491_v61 }
  0xde   :  { %v589_v33 = vadd.f32 %v588_v22, %v587_v14  ;;  %v690_v34 = vadd.f32 %v689_v25, %v688_v15  ;;  %v704_v42 = vrot.slane %v671_v26, 4  ;;  %v612_v43 = vsel %vm611_vm2, %v601_v21, %v602_v28 }
  0xdf   :  { %v603_v36 = vrot.slane %v582_v29, 2  ;;  %v685_v37 = vadd.f32 %v684_v30, %v683_v20  ;;  %v705_v44 = vrot.slane %v678_v32, 3  ;;  %v610_v48 = vsel %vm609_vm3, %v1509_v27, %v608_v24 }
  0xe0   :  { %v604_v39 = vrot.slane %v589_v33, 1  ;;  %v691_v31 = vrot.slane %v690_v34, 1  ;;  %v709_v50 = vsel %vm607_vm1, %v702_v35, %v703_v38  ;;  %v708_v61 = vsel %vm605_vm0, %v643_v40, %v701_v23 }
  0xe1   :  { %v706_v45 = vrot.slane %v685_v37, 2  ;;  %v711_v19 = vsel %vm611_vm2, %v704_v42, %v705_v44  ;;  %v710_v27 = vsel %vm609_vm3, %v708_v61, %v709_v50 }
  0xe2   :  { %v614_v46 = vsel %vm613_vm4, %v603_v36, %v604_v39  ;;  %v692_v47 = vadd.f32 %v691_v31, %v690_v34 }
  0xe3   :  { %v616_v49 = vsel %vm615_vm5, %v612_v43, %v614_v46 }
  0xe4   :  { %v618_v51 = vsel %vm617_vm6, %v610_v48, %v616_v49  ;;  %v707_v52 = vrot.slane %v692_v47, 1 }
  0xe5   :  { %620 = vst [vmem:[%s1545_s3] sm:$0xff] %v618_v51 }
  0xe6   :  { %v712_v53 = vsel %vm613_vm4, %v706_v45, %v707_v52 }
  0xe7   :  { %v713_v54 = vsel %vm615_vm5, %v711_v19, %v712_v53 }
  0xe8   :  { %v714_v55 = vsel %vm617_vm6, %v710_v27, %v713_v54 }
  0xe9   :  { %716 = vst [vmem:[%s1546_s4] sm:$0xff] %v714_v55 }

// kernel: generator_forward.6
= control target key start
LH: loop header
LB: loop body
LE: loop exit
PB: predicated region body
PF: predicated region fallthrough
CT: control target
= control target key end

     0   :  { %s532_s15 = smov 0   ;;  %s601_s0 = inlined_call_operand.vmem [shape: bf16[128,32], index: 0, kind: input, shape index: {}]   ;;  %s602_s1 = inlined_call_operand.vmem [shape: f32[1,32], index: 1, kind: input, shape index: {}]   ;;  %s603_s2 = inlined_call_operand.vmem [shape: f32[1,32], index: 2, kind: input, shape index: {}]   ;;  %s604_s3 = inlined_call_operand.vmem [shape: bf16[32,256], index: 3, kind: input, shape index: {}]   ;;  %s605_s4 = inlined_call_operand.vmem [shape: bf16[128,256], index: 4, kind: output, shape index: {}]  }
   0x1 LB: > { %s425_s16 = sadd.s32 4294967295, %s505_s15   ;;  %p429_p0 = scmp.ge.s32.totalorder %s505_s15, 1  ;;  %s505_s15 = sphi %s532_s15, %s14_s15  }
   0x2   : > { %p163_p1 = scmp.lt.s32.totalorder %s505_s15, 3 }
   0x4   : > { %p164_p2 = pnand %p429_p0, %p163_p1 }
   0x5   : > { %s430_s7 = sshll.u32 (!%p164_p2), %s425_s16, 3 }
   0x6   : > { %167 = sbr.rel (%p164_p2) target bundleno = 187 (0xbb), region = 36  ;;  %p191_p3 = scmp.lt.s32.totalorder (!%p164_p2), %s430_s7, 15 }
   0xb   : > { %v445_v0 = vld [vmem:[%s604_s3 + $0x10] sm:$0xf]  ;;  %v465_v1 = vld [vmem:[%s604_s3 + $0x14] sm:$0xf0]  ;;  %v464_v2 = vld [vmem:[%s604_s3 + $0x14] sm:$0xf] }
   0xc   : > { %v446_v3 = vor.u32 %v465_v1, %v445_v0  ;;  %v447_v4 = vld [vmem:[%s604_s3 + $0x18] sm:$0xf0]  ;;  %v437_v5 = vld [vmem:[%s604_s3] sm:$0xf]  ;;  %v463_v6 = vld [vmem:[%s604_s3 + $0x4] sm:$0xf0] }
   0xd   : > { %v450_v7 = vor.u32 %v464_v2, %v447_v4  ;;  %v462_v8 = vld [vmem:[%s604_s3 + $0x4] sm:$0xf]  ;;  %v439_v9 = vld [vmem:[%s604_s3 + $0x8] sm:$0xf0]  ;;  %v438_v10 = vor.u32 %v463_v6, %v437_v5  ;;  %s607_s7 = smov (!%p191_p3, %s430_s7), 15  ;;  %vm280_vm0 = vcmask 261120  }
   0xe   : > { %299 = vmatpush.bf16.msra.mxu0 %v446_v3  ;;  %485 = vmatpush.bf16.msra.mxu2 %v446_v3  ;;  %v442_v11 = vor.u32 %v462_v8, %v439_v9  ;;  %s431_s8 = sshll.u32 %s607_s7, 2  ;;  %v497_v12 = vld [vmem:[%s602_s1] ss:$0 sm:$0xff]  ;;  %s461_s17 = sshll.u32 %s607_s7, 3 }
   0xf   : > { %328 = vmatpush.bf16.msra.mxu1 %v450_v7  ;;  %487 = vmatpush.bf16.msra.mxu3 %v450_v7  ;;  %s194_s11 = scalar_lea.vmem %s601_s0, %s431_s8  ;;  %v498_v17 = vld [vmem:[%s603_s2] ss:$0 sm:$0xff]  ;;  %s588_s20 = scalar_lea.vmem %s605_s4, %s461_s17 }
  0x10   : > { %v467_v13 = vld [vmem:[%s194_s11] sm:$0xff]   ;;  %v483_v14 = vld [vmem:[%s194_s11 + $0x10] sm:$0xff]   ;;  %v482_v24 = vld [vmem:[%s194_s11 + $0x8] sm:$0xff]  }
  0x11   : > { %v468_v15 = vunpack.c.l.bf16 %v467_v13  ;;  %v469_v16 = vunpack.c.h.bf16 %v467_v13  ;;  %v476_v18 = vunpack.c.l.bf16 %v483_v14  ;;  %v477_v19 = vunpack.c.h.bf16 %v483_v14  ;;  %v484_v25 = vld [vmem:[%s194_s11 + $0x18] sm:$0xff]  }
  0x12   : > { %300 = vmatpush.bf16.msra.mxu0 %v438_v10  ;;  %486 = vmatpush.bf16.msra.mxu2 %v438_v10  ;;  %v472_v30 = vunpack.c.l.bf16 %v482_v24  ;;  %v473_v31 = vunpack.c.h.bf16 %v482_v24  ;;  %v480_v32 = vunpack.c.l.bf16 %v484_v25  ;;  %v481_v33 = vunpack.c.h.bf16 %v484_v25 }
  0x13   : > { %329 = vmatpush.bf16.msra.mxu1 %v442_v11  ;;  %488 = vmatpush.bf16.msra.mxu3 %v442_v11  ;;  %v224_v20 = vmul.f32 %v497_v12, %v468_v15  ;;  %v225_v21 = vmul.f32 %v497_v12, %v469_v16  ;;  %v228_v22 = vmul.f32 %v497_v12, %v476_v18 }
  0x14   : > { %v229_v23 = vmul.f32 %v497_v12, %v477_v19  ;;  %v226_v40 = vmul.f32 %v497_v12, %v472_v30  ;;  %v227_v41 = vmul.f32 %v497_v12, %v473_v31  ;;  %v230_v42 = vmul.f32 %v497_v12, %v480_v32 }
  0x15   : > { %v236_v26 = vadd.f32 %v498_v17, %v224_v20  ;;  %v237_v27 = vadd.f32 %v498_v17, %v225_v21  ;;  %v240_v28 = vadd.f32 %v498_v17, %v228_v22  ;;  %v231_v43 = vmul.f32 %v497_v12, %v481_v33 }
  0x16   : > { %v241_v29 = vadd.f32 %v498_v17, %v229_v23  ;;  %v238_v44 = vadd.f32 %v498_v17, %v226_v40  ;;  %v239_v45 = vadd.f32 %v498_v17, %v227_v41  ;;  %v242_v46 = vadd.f32 %v498_v17, %v230_v42 }
  0x17   : > { %v244_v34 = vmax.f32 %v236_v26, 0.0  ;;  %v245_v35 = vmax.f32 %v237_v27, 0.0  ;;  %v248_v36 = vmax.f32 %v240_v28, 0.0  ;;  %v243_v47 = vadd.f32 %v498_v17, %v231_v43 }
  0x18   : > { %v249_v37 = vmax.f32 %v241_v29, 0.0  ;;  %v246_v48 = vmax.f32 %v238_v44, 0.0  ;;  %v247_v49 = vmax.f32 %v239_v45, 0.0  ;;  %v250_v50 = vmax.f32 %v242_v46, 0.0 }
  0x19   : > { %v252_v38 = vpack.c.bf16 %v245_v35, %v244_v34  ;;  %v251_v51 = vmax.f32 %v243_v47, 0.0 }
  0x1a   : > { %v254_v39 = vpack.c.bf16 %v249_v37, %v248_v36  ;;  %v253_v52 = vpack.c.bf16 %v247_v49, %v246_v48 }
  0x1b   : > { %451 = vmatmul.msk.bf16.vlgmr.msra.gmra.mxu0 %vm280_vm0, %v252_v38  ;;  %455 = vmatmul.msk.bf16.vlgmr.msra.gmra.mxu1 %vm280_vm0, %v252_v38  ;;  %v255_v53 = vpack.c.bf16 %v251_v51, %v250_v50 }
  0x1c   : > { %453 = vmatmul.msk.bf16.vlgmr.msra.gmra.mxu2 %vm280_vm0, %v254_v39  ;;  %457 = vmatmul.msk.bf16.vlgmr.msra.gmra.mxu3 %vm280_vm0, %v254_v39 }
  0x2b   : > { %452 = vmatmul.msk.bf16.gmra.mxu0 %vm280_vm0, %v253_v52  ;;  %456 = vmatmul.msk.bf16.gmra.mxu1 %vm280_vm0, %v253_v52 }
  0x2c   : > { %454 = vmatmul.msk.bf16.gmra.mxu2 %vm280_vm0, %v255_v53  ;;  %458 = vmatmul.msk.bf16.gmra.mxu3 %vm280_vm0, %v255_v53 }
  0x98   : > { %v302_v54 = vpop.f32.mrf.mxu0  ;;  %v331_v55 = vpop.f32.mrf.mxu1 }
  0x99   : > { %v351_v56 = vpack.c.bf16 %v331_v55, %v302_v54 }
  0x9b   : > { %359 = vst [vmem:[%s588_s20] sm:$0xff] %v351_v56 }
  0x9f   : > { %v312_v57 = vpop.f32.mrf.mxu2  ;;  %v341_v58 = vpop.f32.mrf.mxu3 }
  0xa0   : > { %v355_v59 = vpack.c.bf16 %v341_v58, %v312_v57  ;;  %v304_v60 = vpop.f32.mrf.mxu0  ;;  %v333_v61 = vpop.f32.mrf.mxu1 }
  0xa1   : > { %v352_v62 = vpack.c.bf16 %v333_v61, %v304_v60 }
  0xa2   : > { %363 = vst [vmem:[%s588_s20 + $0x20] sm:$0xff] %v355_v59 }
  0xa3   : > { %360 = vst [vmem:[%s588_s20 + $0x8] sm:$0xff] %v352_v62 }
  0xa7   : > { %v314_v63 = vpop.f32.mrf.mxu2  ;;  %v343_v0 = vpop.f32.mrf.mxu3 }
  0xa8   : > { %v356_v1 = vpack.c.bf16 %v343_v0, %v314_v63  ;;  %v307_v2 = vpop.f32.mrf.mxu0  ;;  %v336_v3 = vpop.f32.mrf.mxu1 }
  0xa9   : > { %v353_v4 = vpack.c.bf16 %v336_v3, %v307_v2 }
  0xaa   : > { %364 = vst [vmem:[%s588_s20 + $0x28] sm:$0xff] %v356_v1 }
  0xab   : > { %361 = vst [vmem:[%s588_s20 + $0x10] sm:$0xff] %v353_v4 }
  0xaf   : > { %v317_v5 = vpop.f32.mrf.mxu2  ;;  %v346_v6 = vpop.f32.mrf.mxu3 }
  0xb0   : > { %v357_v7 = vpack.c.bf16 %v346_v6, %v317_v5  ;;  %v309_v8 = vpop.f32.mrf.mxu0  ;;  %v338_v9 = vpop.f32.mrf.mxu1 }
  0xb1   : > { %v354_v10 = vpack.c.bf16 %v338_v9, %v309_v8 }
  0xb2   : > { %365 = vst [vmem:[%s588_s20 + $0x30] sm:$0xff] %v357_v7 }
  0xb3   : > { %362 = vst [vmem:[%s588_s20 + $0x18] sm:$0xff] %v354_v10 }
  0xb7   : > { %v319_v11 = vpop.f32.mrf.mxu2  ;;  %v348_v12 = vpop.f32.mrf.mxu3 }
  0xb8   : > { %v358_v13 = vpack.c.bf16 %v348_v12, %v319_v11 }
  0xba   : > { %366 = vst [vmem:[%s588_s20 + $0x38] sm:$0xff] %v358_v13 }
  0xbb PF: > { %s14_s15 = sadd.s32 1, %s505_s15  }
  0xbc   : > { %p11_p4 = scmp.ge.s32.totalorder %s14_s15, 4  }
  0xbe   :  { %13 = sbr.rel (!%p11_p4) target bundleno = 1 (0x1), region = 66 }

// kernel: generator_forward.7
= control target key start
LH: loop header
LB: loop body
LE: loop exit
PB: predicated region body
PF: predicated region fallthrough
CT: control target
= control target key end

     0   :  { %s904_s15 = smov 0   ;;  %s1057_s0 = inlined_call_operand.vmem [shape: bf16[512,16], index: 0, kind: input, shape index: {}]   ;;  %s1058_s1 = inlined_call_operand.vmem [shape: f32[1,16], index: 1, kind: input, shape index: {}]   ;;  %s1059_s2 = inlined_call_operand.vmem [shape: f32[1,16], index: 2, kind: input, shape index: {}]   ;;  %s1060_s3 = inlined_call_operand.vmem [shape: bf16[16,128], index: 3, kind: input, shape index: {}]   ;;  %s1061_s4 = inlined_call_operand.vmem [shape: bf16[512,128], index: 4, kind: output, shape index: {}]  }
   0x1 LB: > { %s652_s16 = sadd.s32 4294967295, %s877_s15   ;;  %p656_p0 = scmp.ge.s32.totalorder %s877_s15, 1  ;;  %s877_s15 = sphi %s904_s15, %s14_s15  }
   0x2   : > { %p163_p1 = scmp.lt.s32.totalorder %s877_s15, 3 }
   0x4   : > { %p164_p2 = pnand %p656_p0, %p163_p1 }
   0x5   : > { %s657_s19 = sshll.u32 (!%p164_p2), %s652_s16, 5 }
   0x6   : > { %167 = sbr.rel (%p164_p2) target bundleno = 219 (0xdb), region = 36  ;;  %p190_p3 = scmp.lt.s32.totalorder (!%p164_p2), %s657_s19, 63 }
   0xb   : > { %v683_v0 = vld [vmem:[%s1060_s3] sm:$0xff]  ;;  %s1063_s19 = smov (!%p190_p3, %s657_s19), 63  ;;  %vm394_vm0 = vcmask 130048  }
   0xc   : > { %450 = vmatpush.bf16.msra.mxu0 %v683_v0  ;;  %858 = vmatpush.bf16.msra.mxu1 %v683_v0  ;;  %s658_s20 = sshll.u32 %s1063_s19, 2  ;;  %v928_v1 = vld [vmem:[%s1058_s1] ss:$0 sm:$0xff] }
   0xd   : > { %859 = vmatpush.bf16.msra.mxu2 %v683_v0  ;;  %860 = vmatpush.bf16.msra.mxu3 %v683_v0  ;;  %s923_s23 = scalar_lea.vmem %s1057_s0, %s658_s20  ;;  %v936_v7 = vld [vmem:[%s1059_s2] ss:$0 sm:$0xff]  ;;  %s1036_s30 = scalar_lea.vmem %s1061_s4, %s658_s20 }
   0xe   : > { %v685_v2 = vld [vmem:[%s923_s23] sm:$0xff]   ;;  %v828_v31 = vld [vmem:[%s923_s23 + $0x8] sm:$0xff]  }
   0xf   : > { %v831_v3 = vld [vmem:[%s923_s23 + $0x20] sm:$0xff]   ;;  %v686_v5 = vunpack.c.l.bf16 %v685_v2  ;;  %v687_v6 = vunpack.c.h.bf16 %v685_v2  ;;  %v832_v36 = vld [vmem:[%s923_s23 + $0x28] sm:$0xff]   ;;  %v690_v44 = vunpack.c.l.bf16 %v828_v31  ;;  %v691_v45 = vunpack.c.h.bf16 %v828_v31 }
  0x10   : > { %v835_v4 = vld [vmem:[%s923_s23 + $0x40] sm:$0xff]   ;;  %v702_v8 = vunpack.c.l.bf16 %v831_v3  ;;  %v703_v9 = vunpack.c.h.bf16 %v831_v3  ;;  %v836_v41 = vld [vmem:[%s923_s23 + $0x48] sm:$0xff]   ;;  %v706_v49 = vunpack.c.l.bf16 %v832_v36  ;;  %v707_v50 = vunpack.c.h.bf16 %v832_v36 }
  0x11   : > { %v839_v10 = vld [vmem:[%s923_s23 + $0x60] sm:$0xff]   ;;  %v718_v11 = vunpack.c.l.bf16 %v835_v4  ;;  %v719_v12 = vunpack.c.h.bf16 %v835_v4  ;;  %v270_v15 = vmul.f32 %v928_v1, %v686_v5  ;;  %v271_v16 = vmul.f32 %v928_v1, %v687_v6  ;;  %v840_v46 = vld [vmem:[%s923_s23 + $0x68] sm:$0xff]  }
  0x12   : > { %v734_v13 = vunpack.c.l.bf16 %v839_v10  ;;  %v735_v14 = vunpack.c.h.bf16 %v839_v10  ;;  %v278_v17 = vmul.f32 %v928_v1, %v702_v8  ;;  %v279_v18 = vmul.f32 %v928_v1, %v703_v9 }
  0x13   : > { %v286_v19 = vmul.f32 %v928_v1, %v718_v11  ;;  %v287_v20 = vmul.f32 %v928_v1, %v719_v12  ;;  %v306_v23 = vadd.f32 %v936_v7, %v270_v15  ;;  %v307_v24 = vadd.f32 %v936_v7, %v271_v16 }
  0x14   : > { %v294_v21 = vmul.f32 %v928_v1, %v734_v13  ;;  %v295_v22 = vmul.f32 %v928_v1, %v735_v14  ;;  %v314_v25 = vadd.f32 %v936_v7, %v278_v17  ;;  %v315_v26 = vadd.f32 %v936_v7, %v279_v18  ;;  %v829_v13 = vld [vmem:[%s923_s23 + $0x10] sm:$0xff]  }
  0x15   : > { %v322_v27 = vadd.f32 %v936_v7, %v286_v19  ;;  %v323_v28 = vadd.f32 %v936_v7, %v287_v20  ;;  %v338_v32 = vmax.f32 %v306_v23, 0.0  ;;  %v339_v33 = vmax.f32 %v307_v24, 0.0  ;;  %v833_v14 = vld [vmem:[%s923_s23 + $0x30] sm:$0xff]  }
  0x16   : > { %v330_v29 = vadd.f32 %v936_v7, %v294_v21  ;;  %v331_v30 = vadd.f32 %v936_v7, %v295_v22  ;;  %v346_v34 = vmax.f32 %v314_v25, 0.0  ;;  %v347_v35 = vmax.f32 %v315_v26, 0.0  ;;  %v837_v19 = vld [vmem:[%s923_s23 + $0x50] sm:$0xff]  }
  0x17   : > { %v354_v37 = vmax.f32 %v322_v27, 0.0  ;;  %v355_v38 = vmax.f32 %v323_v28, 0.0  ;;  %v370_v42 = vpack.c.bf16 %v339_v33, %v338_v32  ;;  %v272_v51 = vmul.f32 %v928_v1, %v690_v44  ;;  %v841_v20 = vld [vmem:[%s923_s23 + $0x70] sm:$0xff]  }
  0x18   : > { %v362_v39 = vmax.f32 %v330_v29, 0.0  ;;  %v363_v40 = vmax.f32 %v331_v30, 0.0  ;;  %v374_v43 = vpack.c.bf16 %v347_v35, %v346_v34  ;;  %v273_v52 = vmul.f32 %v928_v1, %v691_v45 }
  0x19   : > { %v378_v47 = vpack.c.bf16 %v355_v38, %v354_v37  ;;  %665 = vmatmul.msk.bf16.vlgmr.msra.gmra.mxu0 %vm394_vm0, %v370_v42  ;;  %v722_v53 = vunpack.c.l.bf16 %v836_v41  ;;  %v723_v54 = vunpack.c.h.bf16 %v836_v41  ;;  %v280_v55 = vmul.f32 %v928_v1, %v706_v49 }
  0x1a   : > { %v382_v48 = vpack.c.bf16 %v363_v40, %v362_v39  ;;  %669 = vmatmul.msk.bf16.vlgmr.msra.gmra.mxu1 %vm394_vm0, %v374_v43  ;;  %v281_v56 = vmul.f32 %v928_v1, %v707_v50  ;;  %v738_v57 = vunpack.c.l.bf16 %v840_v46  ;;  %v739_v58 = vunpack.c.h.bf16 %v840_v46 }
  0x1b   : > { %673 = vmatmul.msk.bf16.vlgmr.msra.gmra.mxu2 %vm394_vm0, %v378_v47  ;;  %v288_v59 = vmul.f32 %v928_v1, %v722_v53  ;;  %v289_v60 = vmul.f32 %v928_v1, %v723_v54  ;;  %v308_v63 = vadd.f32 %v936_v7, %v272_v51  ;;  %v309_v0 = vadd.f32 %v936_v7, %v273_v52 }
  0x1c   : > { %677 = vmatmul.msk.bf16.vlgmr.msra.gmra.mxu3 %vm394_vm0, %v382_v48  ;;  %v296_v61 = vmul.f32 %v928_v1, %v738_v57  ;;  %v297_v62 = vmul.f32 %v928_v1, %v739_v58  ;;  %v316_v2 = vadd.f32 %v936_v7, %v280_v55  ;;  %v317_v3 = vadd.f32 %v936_v7, %v281_v56  ;;  %v830_v55 = vld [vmem:[%s923_s23 + $0x18] sm:$0xff]  }
  0x1d   : > { %v324_v4 = vadd.f32 %v936_v7, %v288_v59  ;;  %v325_v5 = vadd.f32 %v936_v7, %v289_v60  ;;  %v340_v9 = vmax.f32 %v308_v63, 0.0  ;;  %v341_v10 = vmax.f32 %v309_v0, 0.0  ;;  %v834_v58 = vld [vmem:[%s923_s23 + $0x38] sm:$0xff]  }
  0x1e   : > { %v332_v6 = vadd.f32 %v936_v7, %v296_v61  ;;  %v333_v8 = vadd.f32 %v936_v7, %v297_v62  ;;  %v348_v11 = vmax.f32 %v316_v2, 0.0  ;;  %v349_v12 = vmax.f32 %v317_v3, 0.0  ;;  %v838_v59 = vld [vmem:[%s923_s23 + $0x58] sm:$0xff]  }
  0x1f   : > { %v356_v15 = vmax.f32 %v324_v4, 0.0  ;;  %v357_v16 = vmax.f32 %v325_v5, 0.0  ;;  %v694_v21 = vunpack.c.l.bf16 %v829_v13  ;;  %v695_v22 = vunpack.c.h.bf16 %v829_v13  ;;  %v842_v60 = vld [vmem:[%s923_s23 + $0x78] sm:$0xff]  }
  0x20   : > { %v364_v17 = vmax.f32 %v332_v6, 0.0  ;;  %v365_v18 = vmax.f32 %v333_v8, 0.0  ;;  %v710_v23 = vunpack.c.l.bf16 %v833_v14  ;;  %v711_v24 = vunpack.c.h.bf16 %v833_v14 }
  0x21   : > { %v371_v25 = vpack.c.bf16 %v341_v10, %v340_v9  ;;  %v375_v26 = vpack.c.bf16 %v349_v12, %v348_v11  ;;  %v726_v27 = vunpack.c.l.bf16 %v837_v19  ;;  %v727_v28 = vunpack.c.h.bf16 %v837_v19 }
  0x22   : > { %v379_v29 = vpack.c.bf16 %v357_v16, %v356_v15  ;;  %v383_v30 = vpack.c.bf16 %v365_v18, %v364_v17  ;;  %v742_v31 = vunpack.c.l.bf16 %v841_v20  ;;  %v743_v32 = vunpack.c.h.bf16 %v841_v20 }
  0x23   : > { %v274_v33 = vmul.f32 %v928_v1, %v694_v21  ;;  %v275_v34 = vmul.f32 %v928_v1, %v695_v22  ;;  %v282_v35 = vmul.f32 %v928_v1, %v710_v23  ;;  %v283_v36 = vmul.f32 %v928_v1, %v711_v24 }
  0x24   : > { %v290_v37 = vmul.f32 %v928_v1, %v726_v27  ;;  %v291_v38 = vmul.f32 %v928_v1, %v727_v28  ;;  %v298_v39 = vmul.f32 %v928_v1, %v742_v31  ;;  %v299_v40 = vmul.f32 %v928_v1, %v743_v32 }
  0x25   : > { %v310_v41 = vadd.f32 %v936_v7, %v274_v33  ;;  %v311_v42 = vadd.f32 %v936_v7, %v275_v34  ;;  %v318_v43 = vadd.f32 %v936_v7, %v282_v35  ;;  %v319_v44 = vadd.f32 %v936_v7, %v283_v36 }
  0x26   : > { %v326_v45 = vadd.f32 %v936_v7, %v290_v37  ;;  %v327_v46 = vadd.f32 %v936_v7, %v291_v38  ;;  %v334_v47 = vadd.f32 %v936_v7, %v298_v39  ;;  %v335_v48 = vadd.f32 %v936_v7, %v299_v40 }
  0x27   : > { %v342_v49 = vmax.f32 %v310_v41, 0.0  ;;  %v343_v50 = vmax.f32 %v311_v42, 0.0  ;;  %v350_v51 = vmax.f32 %v318_v43, 0.0  ;;  %v351_v52 = vmax.f32 %v319_v44, 0.0 }
  0x28   : > { %v358_v53 = vmax.f32 %v326_v45, 0.0  ;;  %v359_v54 = vmax.f32 %v327_v46, 0.0  ;;  %v366_v56 = vmax.f32 %v334_v47, 0.0  ;;  %v367_v57 = vmax.f32 %v335_v48, 0.0 }
  0x29   : > { %666 = vmatmul.msk.bf16.gmra.mxu0 %vm394_vm0, %v371_v25  ;;  %v372_v61 = vpack.c.bf16 %v343_v50, %v342_v49  ;;  %v376_v62 = vpack.c.bf16 %v351_v52, %v350_v51  ;;  %v698_v63 = vunpack.c.l.bf16 %v830_v55  ;;  %v699_v0 = vunpack.c.h.bf16 %v830_v55 }
  0x2a   : > { %670 = vmatmul.msk.bf16.gmra.mxu1 %vm394_vm0, %v375_v26  ;;  %v380_v2 = vpack.c.bf16 %v359_v54, %v358_v53  ;;  %v714_v3 = vunpack.c.l.bf16 %v834_v58  ;;  %v715_v4 = vunpack.c.h.bf16 %v834_v58  ;;  %v730_v5 = vunpack.c.l.bf16 %v838_v59 }
  0x2b   : > { %674 = vmatmul.msk.bf16.gmra.mxu2 %vm394_vm0, %v379_v29  ;;  %v384_v6 = vpack.c.bf16 %v367_v57, %v366_v56  ;;  %v731_v8 = vunpack.c.h.bf16 %v838_v59  ;;  %v746_v9 = vunpack.c.l.bf16 %v842_v60  ;;  %v747_v10 = vunpack.c.h.bf16 %v842_v60 }
  0x2c   : > { %678 = vmatmul.msk.bf16.gmra.mxu3 %vm394_vm0, %v383_v30  ;;  %v276_v11 = vmul.f32 %v928_v1, %v698_v63  ;;  %v277_v12 = vmul.f32 %v928_v1, %v699_v0  ;;  %v284_v13 = vmul.f32 %v928_v1, %v714_v3  ;;  %v285_v14 = vmul.f32 %v928_v1, %v715_v4 }
  0x2d   : > { %v292_v15 = vmul.f32 %v928_v1, %v730_v5  ;;  %v293_v16 = vmul.f32 %v928_v1, %v731_v8  ;;  %v300_v17 = vmul.f32 %v928_v1, %v746_v9  ;;  %v301_v18 = vmul.f32 %v928_v1, %v747_v10 }
  0x2e   : > { %v312_v19 = vadd.f32 %v936_v7, %v276_v11  ;;  %v313_v20 = vadd.f32 %v936_v7, %v277_v12  ;;  %v320_v21 = vadd.f32 %v936_v7, %v284_v13  ;;  %v321_v22 = vadd.f32 %v936_v7, %v285_v14 }
  0x2f   : > { %v328_v23 = vadd.f32 %v936_v7, %v292_v15  ;;  %v329_v24 = vadd.f32 %v936_v7, %v293_v16  ;;  %v336_v25 = vadd.f32 %v936_v7, %v300_v17  ;;  %v337_v26 = vadd.f32 %v936_v7, %v301_v18 }
  0x30   : > { %v344_v27 = vmax.f32 %v312_v19, 0.0  ;;  %v345_v28 = vmax.f32 %v313_v20, 0.0  ;;  %v352_v29 = vmax.f32 %v320_v21, 0.0  ;;  %v353_v1 = vmax.f32 %v321_v22, 0.0 }
  0x31   : > { %v360_v30 = vmax.f32 %v328_v23, 0.0  ;;  %v361_v31 = vmax.f32 %v329_v24, 0.0  ;;  %v368_v32 = vmax.f32 %v336_v25, 0.0  ;;  %v369_v33 = vmax.f32 %v337_v26, 0.0 }
  0x32   : > { %v373_v34 = vpack.c.bf16 %v345_v28, %v344_v27  ;;  %v377_v35 = vpack.c.bf16 %v353_v1, %v352_v29 }
  0x33   : > { %v381_v36 = vpack.c.bf16 %v361_v31, %v360_v30  ;;  %v385_v37 = vpack.c.bf16 %v369_v33, %v368_v32 }
  0x39   : > { %667 = vmatmul.msk.bf16.gmra.mxu0 %vm394_vm0, %v372_v61 }
  0x3a   : > { %671 = vmatmul.msk.bf16.gmra.mxu1 %vm394_vm0, %v376_v62 }
  0x3b   : > { %675 = vmatmul.msk.bf16.gmra.mxu2 %vm394_vm0, %v380_v2 }
  0x3c   : > { %679 = vmatmul.msk.bf16.gmra.mxu3 %vm394_vm0, %v384_v6 }
  0x49   : > { %668 = vmatmul.msk.bf16.gmra.mxu0 %vm394_vm0, %v373_v34 }
  0x4a   : > { %672 = vmatmul.msk.bf16.gmra.mxu1 %vm394_vm0, %v377_v35 }
  0x4b   : > { %676 = vmatmul.msk.bf16.gmra.mxu2 %vm394_vm0, %v381_v36 }
  0x4c   : > { %680 = vmatmul.msk.bf16.gmra.mxu3 %vm394_vm0, %v385_v37 }
  0x96   : > { %v452_v7 = vpop.f32.mrf.mxu0 }
  0x97   : > { %v472_v38 = vpop.f32.mrf.mxu1 }
  0x9e   : > { %v492_v39 = vpop.f32.mrf.mxu2  ;;  %v454_v41 = vpop.f32.mrf.mxu0 }
  0x9f   : > { %v512_v40 = vpop.f32.mrf.mxu3  ;;  %v474_v42 = vpop.f32.mrf.mxu1  ;;  %v751_v43 = vpack.c.bf16 %v454_v41, %v452_v7 }
  0xa0   : > { %v771_v44 = vpack.c.bf16 %v474_v42, %v472_v38 }
  0xa1   : > { %752 = vst [vmem:[%s1036_s30] sm:$0xff] %v751_v43  }
  0xa2   : > { %846 = vst [vmem:[%s1036_s30 + $0x20] sm:$0xff] %v771_v44  }
  0xa6   : > { %v494_v45 = vpop.f32.mrf.mxu2  ;;  %v457_v49 = vpop.f32.mrf.mxu0 }
  0xa7   : > { %v514_v46 = vpop.f32.mrf.mxu3  ;;  %v791_v47 = vpack.c.bf16 %v494_v45, %v492_v39  ;;  %v477_v50 = vpop.f32.mrf.mxu1 }
  0xa8   : > { %v811_v48 = vpack.c.bf16 %v514_v46, %v512_v40 }
  0xa9   : > { %850 = vst [vmem:[%s1036_s30 + $0x40] sm:$0xff] %v791_v47  }
  0xaa   : > { %854 = vst [vmem:[%s1036_s30 + $0x60] sm:$0xff] %v811_v48  }
  0xae   : > { %v497_v51 = vpop.f32.mrf.mxu2  ;;  %v459_v53 = vpop.f32.mrf.mxu0 }
  0xaf   : > { %v517_v52 = vpop.f32.mrf.mxu3  ;;  %v479_v54 = vpop.f32.mrf.mxu1  ;;  %v756_v55 = vpack.c.bf16 %v459_v53, %v457_v49 }
  0xb0   : > { %v776_v56 = vpack.c.bf16 %v479_v54, %v477_v50 }
  0xb1   : > { %843 = vst [vmem:[%s1036_s30 + $0x8] sm:$0xff] %v756_v55  }
  0xb2   : > { %847 = vst [vmem:[%s1036_s30 + $0x28] sm:$0xff] %v776_v56  }
  0xb6   : > { %v499_v57 = vpop.f32.mrf.mxu2  ;;  %v462_v61 = vpop.f32.mrf.mxu0 }
  0xb7   : > { %v519_v58 = vpop.f32.mrf.mxu3  ;;  %v796_v59 = vpack.c.bf16 %v499_v57, %v497_v51  ;;  %v482_v62 = vpop.f32.mrf.mxu1 }
  0xb8   : > { %v816_v60 = vpack.c.bf16 %v519_v58, %v517_v52 }
  0xb9   : > { %851 = vst [vmem:[%s1036_s30 + $0x48] sm:$0xff] %v796_v59  }
  0xba   : > { %855 = vst [vmem:[%s1036_s30 + $0x68] sm:$0xff] %v816_v60  }
  0xbe   : > { %v502_v63 = vpop.f32.mrf.mxu2  ;;  %v464_v2 = vpop.f32.mrf.mxu0 }
  0xbf   : > { %v522_v0 = vpop.f32.mrf.mxu3  ;;  %v484_v3 = vpop.f32.mrf.mxu1  ;;  %v761_v4 = vpack.c.bf16 %v464_v2, %v462_v61 }
  0xc0   : > { %v781_v5 = vpack.c.bf16 %v484_v3, %v482_v62 }
  0xc1   : > { %844 = vst [vmem:[%s1036_s30 + $0x10] sm:$0xff] %v761_v4  }
  0xc2   : > { %848 = vst [vmem:[%s1036_s30 + $0x30] sm:$0xff] %v781_v5  }
  0xc6   : > { %v504_v6 = vpop.f32.mrf.mxu2  ;;  %v467_v11 = vpop.f32.mrf.mxu0 }
  0xc7   : > { %v524_v8 = vpop.f32.mrf.mxu3  ;;  %v801_v9 = vpack.c.bf16 %v504_v6, %v502_v63  ;;  %v487_v12 = vpop.f32.mrf.mxu1 }
  0xc8   : > { %v821_v10 = vpack.c.bf16 %v524_v8, %v522_v0 }
  0xc9   : > { %852 = vst [vmem:[%s1036_s30 + $0x50] sm:$0xff] %v801_v9  }
  0xca   : > { %856 = vst [vmem:[%s1036_s30 + $0x70] sm:$0xff] %v821_v10  }
  0xce   : > { %v507_v13 = vpop.f32.mrf.mxu2  ;;  %v469_v15 = vpop.f32.mrf.mxu0 }
  0xcf   : > { %v527_v14 = vpop.f32.mrf.mxu3  ;;  %v489_v16 = vpop.f32.mrf.mxu1  ;;  %v766_v17 = vpack.c.bf16 %v469_v15, %v467_v11 }
  0xd0   : > { %v786_v18 = vpack.c.bf16 %v489_v16, %v487_v12 }
  0xd1   : > { %845 = vst [vmem:[%s1036_s30 + $0x18] sm:$0xff] %v766_v17  }
  0xd2   : > { %849 = vst [vmem:[%s1036_s30 + $0x38] sm:$0xff] %v786_v18  }
  0xd6   : > { %v509_v19 = vpop.f32.mrf.mxu2 }
  0xd7   : > { %v529_v20 = vpop.f32.mrf.mxu3  ;;  %v806_v21 = vpack.c.bf16 %v509_v19, %v507_v13 }
  0xd8   : > { %v826_v22 = vpack.c.bf16 %v529_v20, %v527_v14 }
  0xd9   : > { %853 = vst [vmem:[%s1036_s30 + $0x58] sm:$0xff] %v806_v21  }
  0xda   : > { %857 = vst [vmem:[%s1036_s30 + $0x78] sm:$0xff] %v826_v22  }
  0xdb PF: > { %s14_s15 = sadd.s32 1, %s877_s15  }
  0xdc   : > { %p11_p4 = scmp.ge.s32.totalorder %s14_s15, 4  }
  0xde   :  { %13 = sbr.rel (!%p11_p4) target bundleno = 1 (0x1), region = 66 }

</bundles_post_ra>
